<compile_context>
chip_gen: v7x
topology: tpu7x:2x2x1
jax: 0.10.0
libtpu: 0.0.40
codegen_flags: <defaults>
</compile_context>

<pallas_src>
import functools

import jax
import jax.numpy as jnp
from jax.experimental import pallas as pl
from jax.experimental.pallas import tpu as pltpu

EPS = 1e-5
LANES = 128  # lane-padded feature width (units 32 -> 128)


# --------------------------- helpers traced inside kernels -------------------
def _silu(x):
    return x * jax.nn.sigmoid(x)


def _batchnorm(z, gamma, beta):
    # training-mode BatchNorm1d, single-pass batch statistics (biased variance)
    mean = jnp.mean(z, axis=0, keepdims=True)
    mean_sq = jnp.mean(z * z, axis=0, keepdims=True)
    var = jnp.maximum(mean_sq - mean * mean, 0.0)
    return (z - mean) * jax.lax.rsqrt(var + EPS) * gamma + beta


# ----------------------------------- fused kernel ----------------------------
def fused_emb_kernel(
    units,                                   # static (bound via functools.partial)
    x_ref, e_ref, g0_ref, g1_ref, g0t_ref,
    v0w_ref, v0b_ref, el0w_ref, el0b_ref,
    vcw_ref, vcb_ref,                        # fused v1..v4: [units, 4*LANES], [1, 4*LANES]
    ew_ref, eb_ref,                          # e_lins0:      [units, LANES],   [1, LANES]
    vbg_ref, vbb_ref, ebg_ref, ebb_ref,      # BatchNorm affine params
    o_ref,
    h_s, w_s, g0_s, g1_s, g0t_s,
):
    d = pl.program_id(0)

    # ---- step 0: initial embeddings + one-time operator casts ---------------
    @pl.when(d == 0)
    def _():
        h_s[...] = _silu(
            jnp.dot(x_ref[...], v0w_ref[...], preferred_element_type=jnp.float32)
            + v0b_ref[...])
        w_s[...] = _silu(
            jnp.dot(e_ref[...], el0w_ref[...], preferred_element_type=jnp.float32)
            + el0b_ref[...])
        # hoisted bf16 -> f32 casts: the one-hot operators never change.
        g0_s[...] = g0_ref[...].astype(jnp.float32)
        g1_s[...] = g1_ref[...].astype(jnp.float32)
        g0t_s[...] = g0t_ref[...].astype(jnp.float32)

    x0 = h_s[...]                      # [N, LANES]; padded lanes are exactly zero
    w0 = w_s[...]                      # [E, LANES]
    x0k = x0[:, :units]                # K = units operand for per-layer matmuls
    w0k = w0[:, :units]
    g0 = g0_s[...]                     # [E, N]  rows select idx0
    g1 = g1_s[...]                     # [E, N]  rows select idx1
    g0t = g0t_s[...]                   # [N, E]  scatter-sum onto idx0

    # fused node-side linears: one [N, units] x [units, 4*LANES] matmul
    xcat = (jnp.dot(x0k, vcw_ref[...], preferred_element_type=jnp.float32)
            + vcb_ref[...])
    x1 = xcat[:, 0 * LANES:1 * LANES]
    x2 = xcat[:, 1 * LANES:2 * LANES]
    x3 = xcat[:, 2 * LANES:3 * LANES]
    x4 = xcat[:, 3 * LANES:4 * LANES]

    # ---- edge update first (commits w carry + output before the node path) --
    w1 = jnp.dot(w0k, ew_ref[...], preferred_element_type=jnp.float32) + eb_ref[...]
    x3g = jnp.dot(g0, x3, preferred_element_type=jnp.float32)        # x3[idx0]
    x4g = jnp.dot(g1, x4, preferred_element_type=jnp.float32)        # x4[idx1]
    w_new = w0 + _silu(_batchnorm(w1 + x3g + x4g, ebg_ref[...], ebb_ref[...]))
    w_s[...] = w_new

    # Only the final edge embedding ever leaves VMEM (single masked store).
    @pl.when(d == pl.num_programs(0) - 1)
    def _():
        o_ref[...] = w_new[:, :units]

    # ---- node update (uses the pre-update x0, w0) ----------------------------
    gathered = jnp.dot(g1, x2, preferred_element_type=jnp.float32)   # x2[idx1]
    msg = jax.nn.sigmoid(w0) * gathered
    agg = jnp.dot(g0t, msg, preferred_element_type=jnp.float32)      # scatter-sum -> [N, LANES]
    h_s[...] = x0 + _silu(_batchnorm(x1 + agg, vbg_ref[...], vbb_ref[...]))


# ------------------------------- wrapper --------------------------------------
def _pad2(a, rows, cols):
    return jnp.pad(a, ((0, rows - a.shape[0]), (0, cols - a.shape[1])))


@functools.partial(jax.jit, static_argnames=("depth", "units"))
def emb_net_pallas(params, x, edge_index, edge_attr, depth, units):
    n, feats = x.shape
    e = edge_attr.shape[0]
    idx0, idx1 = edge_index[0], edge_index[1]

    # Dense one-hot gather/scatter operators (0/1 is exact in bf16). The scatter
    # operator is pre-transposed so the in-kernel scatter-sum is a plain matmul.
    g0 = jax.nn.one_hot(idx0, n, dtype=jnp.bfloat16)   # [E, N]
    g1 = jax.nn.one_hot(idx1, n, dtype=jnp.bfloat16)   # [E, N]
    g0t = g0.T                                         # [N, E]

    f8 = max(8, ((feats + 7) // 8) * 8)
    x_p = _pad2(x, n, f8)
    e_p = _pad2(edge_attr, e, 8)

    v0w = _pad2(params["v_lin0_w"], f8, LANES)
    v0b = _pad2(params["v_lin0_b"], 1, LANES)
    el0w = _pad2(params["e_lin0_w"], 8, LANES)
    el0b = _pad2(params["e_lin0_b"], 1, LANES)

    # Fused per-layer node weights: concat v1..v4 along the output dim; keep the
    # contraction dim at its true size (units); pad only the output lanes.
    vcw = jnp.stack([
        jnp.concatenate([_pad2(params[f"{nm}_w"][i], units, LANES)
                         for nm in ("v1", "v2", "v3", "v4")], axis=1)
        for i in range(depth)])                                 # [depth, units, 4*LANES]
    vcb = jnp.stack([
        jnp.concatenate([_pad2(params[f"{nm}_b"][i], 1, LANES)
                         for nm in ("v1", "v2", "v3", "v4")], axis=1)
        for i in range(depth)])                                 # [depth, 1, 4*LANES]
    ew = jnp.stack([_pad2(params["e0_w"][i], units, LANES) for i in range(depth)])
    eb = jnp.stack([_pad2(params["e0_b"][i], 1, LANES) for i in range(depth)])

    def stack_b(name):
        return jnp.stack([_pad2(a, 1, LANES) for a in params[name]])

    vbg, vbb = stack_b("vbn_g"), stack_b("vbn_b")
    ebg, ebb = stack_b("ebn_g"), stack_b("ebn_b")

    def const(shape):
        zeros = (0,) * len(shape)
        return pl.BlockSpec(shape, lambda d: zeros)             # resident across grid

    mat4 = pl.BlockSpec((None, units, 4 * LANES), lambda d: (d, 0, 0))
    vec4 = pl.BlockSpec((None, 1, 4 * LANES), lambda d: (d, 0, 0))
    mat1 = pl.BlockSpec((None, units, LANES), lambda d: (d, 0, 0))
    vec1 = pl.BlockSpec((None, 1, LANES), lambda d: (d, 0, 0))

    in_specs = [
        const((n, f8)), const((e, 8)),
        const((e, n)), const((e, n)), const((n, e)),
        const((f8, LANES)), const((1, LANES)), const((8, LANES)), const((1, LANES)),
        mat4, vec4, mat1, vec1,
        vec1, vec1, vec1, vec1,
    ]

    return pl.pallas_call(
        functools.partial(fused_emb_kernel, units),
        out_shape=jax.ShapeDtypeStruct((e, units), jnp.float32),
        grid=(depth,),
        in_specs=in_specs,
        out_specs=pl.BlockSpec((e, units), lambda d: (0, 0)),
        scratch_shapes=[
            pltpu.VMEM((n, LANES), jnp.float32),   # h carry
            pltpu.VMEM((e, LANES), jnp.float32),   # w carry
            pltpu.VMEM((e, n), jnp.float32),       # g0  (cast once)
            pltpu.VMEM((e, n), jnp.float32),       # g1  (cast once)
            pltpu.VMEM((n, e), jnp.float32),       # g0t (cast once)
        ],
        compiler_params=pltpu.CompilerParams(
            dimension_semantics=("arbitrary",),          # depth is a sequential carry
            vmem_limit_bytes=32 * 1024 * 1024),          # explicit (v7x default is tight)
    )(x_p, e_p, g0, g1, g0t, v0w, v0b, el0w, el0b,
      vcw, vcb, ew, eb, vbg, vbb, ebg, ebb)


# ------------------------------ reference (plain JAX) --------------------------
def _batchnorm_ref(z, gamma, beta):
    mean = jnp.mean(z, axis=0, keepdims=True)
    var = jnp.mean(jnp.square(z - mean), axis=0, keepdims=True)
    return (z - mean) * jax.lax.rsqrt(var + EPS) * gamma + beta


def emb_net_reference(params, x, edge_index, edge_attr, depth):
    n = x.shape[0]
    idx0, idx1 = edge_index[0], edge_index[1]
    h = _silu(x @ params["v_lin0_w"] + params["v_lin0_b"])
    w = _silu(edge_attr @ params["e_lin0_w"] + params["e_lin0_b"])
    for i in range(depth):
        x0, w0 = h, w
        x1 = x0 @ params["v1_w"][i] + params["v1_b"][i]
        x2 = x0 @ params["v2_w"][i] + params["v2_b"][i]
        x3 = x0 @ params["v3_w"][i] + params["v3_b"][i]
        x4 = x0 @ params["v4_w"][i] + params["v4_b"][i]
        w1 = w0 @ params["e0_w"][i] + params["e0_b"][i]
        msg = jax.nn.sigmoid(w0) * x2[idx1]
        agg = jax.ops.segment_sum(msg, idx0, num_segments=n)
        h = x0 + _silu(_batchnorm_ref(x1 + agg, params["vbn_g"][i], params["vbn_b"][i]))
        w = w0 + _silu(_batchnorm_ref(w1 + x3[idx0] + x4[idx1],
                                      params["ebn_g"][i], params["ebn_b"][i]))
    return w


# ---------------------------------- params -------------------------------------
def init_params(key, depth, feats, units):
    def lin(k, fan_in, fan_out):
        kw, kb = jax.random.split(k)
        bound = 1.0 / (fan_in ** 0.5)
        wgt = jax.random.uniform(kw, (fan_in, fan_out), jnp.float32, -bound, bound)
        b = jax.random.uniform(kb, (1, fan_out), jnp.float32, -bound, bound)
        return wgt, b

    keys = iter(jax.random.split(key, 2 + 5 * depth))
    p = {}
    p["v_lin0_w"], p["v_lin0_b"] = lin(next(keys), feats, units)
    p["e_lin0_w"], p["e_lin0_b"] = lin(next(keys), 1, units)
    for name in ("v1", "v2", "v3", "v4", "e0"):
        ws, bs = [], []
        for _ in range(depth):
            wgt, b = lin(next(keys), units, units)
            ws.append(wgt)
            bs.append(b)
        p[name + "_w"], p[name + "_b"] = ws, bs
    # gnn.BatchNorm affine init: weight=1, bias=0
    p["vbn_g"] = [jnp.ones((1, units), jnp.float32) for _ in range(depth)]
    p["vbn_b"] = [jnp.zeros((1, units), jnp.float32) for _ in range(depth)]
    p["ebn_g"] = [jnp.ones((1, units), jnp.float32) for _ in range(depth)]
    p["ebn_b"] = [jnp.zeros((1, units), jnp.float32) for _ in range(depth)]
    return p


# ------------------------------------ main --------------------------------------
if __name__ == "__main__":
    N, FEATS, UNITS, DEPTH, E = 16, 2, 32, 3, 64

    key = jax.random.PRNGKey(0)
    k_x, k_e, k_a, k_p = jax.random.split(key, 4)
    x = jax.random.normal(k_x, (N, FEATS), jnp.float32)                  # node coords
    edge_index = jax.random.randint(k_e, (2, E), 0, N, dtype=jnp.int32)  # [2, E]
    edge_attr = jax.random.normal(k_a, (E, 1), jnp.float32)              # edge weights
    params = init_params(k_p, DEPTH, FEATS, UNITS)

    out = emb_net_pallas(params, x, edge_index, edge_attr, depth=DEPTH, units=UNITS)
    out = jax.block_until_ready(out)
    assert out.shape == (E, UNITS)

    ref = emb_net_reference(params, x, edge_index, edge_attr, DEPTH)
    max_err = float(jnp.max(jnp.abs(out - ref)))
    assert max_err < 1e-3, f"mismatch vs reference: {max_err}"

    print("KERNEL_OK")
</pallas_src>

<mosaic_0001>
module attributes {stable_mosaic.version = 11 : i64} {
  func.func @fused_emb_kernel(%arg0: i32, %arg1: memref<16x8xf32, #tpu.memory_space<vmem>>, %arg2: memref<64x8xf32, #tpu.memory_space<vmem>>, %arg3: memref<64x16xbf16, #tpu.memory_space<vmem>>, %arg4: memref<64x16xbf16, #tpu.memory_space<vmem>>, %arg5: memref<16x64xbf16, #tpu.memory_space<vmem>>, %arg6: memref<8x128xf32, #tpu.memory_space<vmem>>, %arg7: memref<1x128xf32, #tpu.memory_space<vmem>>, %arg8: memref<8x128xf32, #tpu.memory_space<vmem>>, %arg9: memref<1x128xf32, #tpu.memory_space<vmem>>, %arg10: memref<1x32x512xf32, #tpu.memory_space<vmem>>, %arg11: memref<1x1x512xf32, #tpu.memory_space<vmem>>, %arg12: memref<1x32x128xf32, #tpu.memory_space<vmem>>, %arg13: memref<1x1x128xf32, #tpu.memory_space<vmem>>, %arg14: memref<1x1x128xf32, #tpu.memory_space<vmem>>, %arg15: memref<1x1x128xf32, #tpu.memory_space<vmem>>, %arg16: memref<1x1x128xf32, #tpu.memory_space<vmem>>, %arg17: memref<1x1x128xf32, #tpu.memory_space<vmem>>, %arg18: memref<64x32xf32, #tpu.memory_space<vmem>>, %arg19: memref<16x128xf32, #tpu.memory_space<vmem>>, %arg20: memref<64x128xf32, #tpu.memory_space<vmem>>, %arg21: memref<64x16xf32, #tpu.memory_space<vmem>>, %arg22: memref<64x16xf32, #tpu.memory_space<vmem>>, %arg23: memref<16x64xf32, #tpu.memory_space<vmem>>) attributes {dimension_semantics = [#tpu.dimension_semantics<arbitrary>], iteration_bounds = array<i64: 3>, scalar_prefetch = 0 : i64, scratch_operands = 5 : i64, tpu.core_type = #tpu.core_type<tc>, window_params = [{pipeline_mode = #tpu.pipeline_mode<synchronous>, transform_indices = @transform_0, window_bounds = array<i64: 16, 8>}, {pipeline_mode = #tpu.pipeline_mode<synchronous>, transform_indices = @transform_1, window_bounds = array<i64: 64, 8>}, {pipeline_mode = #tpu.pipeline_mode<synchronous>, transform_indices = @transform_2, window_bounds = array<i64: 64, 16>}, {pipeline_mode = #tpu.pipeline_mode<synchronous>, transform_indices = @transform_3, window_bounds = array<i64: 64, 16>}, {pipeline_mode = #tpu.pipeline_mode<synchronous>, transform_indices = @transform_4, window_bounds = array<i64: 16, 64>}, {pipeline_mode = #tpu.pipeline_mode<synchronous>, transform_indices = @transform_5, window_bounds = array<i64: 8, 128>}, {pipeline_mode = #tpu.pipeline_mode<synchronous>, transform_indices = @transform_6, window_bounds = array<i64: 1, 128>}, {pipeline_mode = #tpu.pipeline_mode<synchronous>, transform_indices = @transform_7, window_bounds = array<i64: 8, 128>}, {pipeline_mode = #tpu.pipeline_mode<synchronous>, transform_indices = @transform_8, window_bounds = array<i64: 1, 128>}, {transform_indices = @transform_9, window_bounds = array<i64: 1, 32, 512>}, {transform_indices = @transform_10, window_bounds = array<i64: 1, 1, 512>}, {transform_indices = @transform_11, window_bounds = array<i64: 1, 32, 128>}, {transform_indices = @transform_12, window_bounds = array<i64: 1, 1, 128>}, {transform_indices = @transform_13, window_bounds = array<i64: 1, 1, 128>}, {transform_indices = @transform_14, window_bounds = array<i64: 1, 1, 128>}, {transform_indices = @transform_15, window_bounds = array<i64: 1, 1, 128>}, {transform_indices = @transform_16, window_bounds = array<i64: 1, 1, 128>}, {pipeline_mode = #tpu.pipeline_mode<synchronous>, transform_indices = @transform_17, window_bounds = array<i64: 64, 32>}]} {
    %c0_i32 = arith.constant 0 : i32
    %0 = arith.cmpi eq, %arg0, %c0_i32 : i32
    %1 = arith.extui %0 : i1 to i32
    %c0_i32_0 = arith.constant 0 : i32
    %2 = arith.cmpi ne, %1, %c0_i32_0 : i32
    scf.if %2 {
      %c0_59 = arith.constant 0 : index
      %c0_60 = arith.constant 0 : index
      %116 = vector.load %arg1[%c0_59, %c0_60] : memref<16x8xf32, #tpu.memory_space<vmem>>, vector<16x8xf32>
      %c0_61 = arith.constant 0 : index
      %c0_62 = arith.constant 0 : index
      %117 = vector.load %arg6[%c0_61, %c0_62] : memref<8x128xf32, #tpu.memory_space<vmem>>, vector<8x128xf32>
      %cst_63 = arith.constant dense<0.000000e+00> : vector<16x128xf32>
      %118 = tpu.matmul %116, %117, %cst_63 {dimension_numbers = #tpu.dot_dimension_numbers<[1], [0], [0], [1], [0, 0, 1, 1], [], []>} : vector<16x8xf32>, vector<8x128xf32>, vector<16x128xf32> -> vector<16x128xf32>
      %c0_64 = arith.constant 0 : index
      %c0_65 = arith.constant 0 : index
      %119 = vector.load %arg7[%c0_64, %c0_65] : memref<1x128xf32, #tpu.memory_space<vmem>>, vector<1x128xf32>
      %120 = vector.broadcast %119 : vector<1x128xf32> to vector<16x128xf32>
      %121 = arith.addf %118, %120 : vector<16x128xf32>
      %122 = arith.negf %121 : vector<16x128xf32>
      %123 = math.exp %122 : vector<16x128xf32>
      %cst_66 = arith.constant 1.000000e+00 : f32
      %124 = vector.broadcast %cst_66 : f32 to vector<16x128xf32>
      %125 = arith.addf %124, %123 : vector<16x128xf32>
      %126 = arith.divf %124, %125 : vector<16x128xf32>
      %127 = arith.mulf %121, %126 : vector<16x128xf32>
      %c0_67 = arith.constant 0 : index
      %c0_68 = arith.constant 0 : index
      %128 = vector.load %arg19[%c0_67, %c0_68] : memref<16x128xf32, #tpu.memory_space<vmem>>, vector<16x128xf32>
      tpu.vector_store %arg19[%c0_67, %c0_68], %127 {strides = array<i32>} : memref<16x128xf32, #tpu.memory_space<vmem>>, vector<16x128xf32>,
      %c0_69 = arith.constant 0 : index
      %c0_70 = arith.constant 0 : index
      %129 = vector.load %arg2[%c0_69, %c0_70] : memref<64x8xf32, #tpu.memory_space<vmem>>, vector<64x8xf32>
      %c0_71 = arith.constant 0 : index
      %c0_72 = arith.constant 0 : index
      %130 = vector.load %arg8[%c0_71, %c0_72] : memref<8x128xf32, #tpu.memory_space<vmem>>, vector<8x128xf32>
      %cst_73 = arith.constant dense<0.000000e+00> : vector<64x128xf32>
      %131 = tpu.matmul %129, %130, %cst_73 {dimension_numbers = #tpu.dot_dimension_numbers<[1], [0], [0], [1], [0, 0, 1, 1], [], []>} : vector<64x8xf32>, vector<8x128xf32>, vector<64x128xf32> -> vector<64x128xf32>
      %c0_74 = arith.constant 0 : index
      %c0_75 = arith.constant 0 : index
      %132 = vector.load %arg9[%c0_74, %c0_75] : memref<1x128xf32, #tpu.memory_space<vmem>>, vector<1x128xf32>
      %133 = vector.broadcast %132 : vector<1x128xf32> to vector<64x128xf32>
      %134 = arith.addf %131, %133 : vector<64x128xf32>
      %135 = arith.negf %134 : vector<64x128xf32>
      %136 = math.exp %135 : vector<64x128xf32>
      %cst_76 = arith.constant 1.000000e+00 : f32
      %137 = vector.broadcast %cst_76 : f32 to vector<64x128xf32>
      %138 = arith.addf %137, %136 : vector<64x128xf32>
      %139 = arith.divf %137, %138 : vector<64x128xf32>
      %140 = arith.mulf %134, %139 : vector<64x128xf32>
      %c0_77 = arith.constant 0 : index
      %c0_78 = arith.constant 0 : index
      %141 = vector.load %arg20[%c0_77, %c0_78] : memref<64x128xf32, #tpu.memory_space<vmem>>, vector<64x128xf32>
      tpu.vector_store %arg20[%c0_77, %c0_78], %140 {strides = array<i32>} : memref<64x128xf32, #tpu.memory_space<vmem>>, vector<64x128xf32>,
      %c0_79 = arith.constant 0 : index
      %c0_80 = arith.constant 0 : index
      %142 = vector.load %arg3[%c0_79, %c0_80] : memref<64x16xbf16, #tpu.memory_space<vmem>>, vector<64x16xbf16>
      %143 = arith.extf %142 : vector<64x16xbf16> to vector<64x16xf32>
      %c0_81 = arith.constant 0 : index
      %c0_82 = arith.constant 0 : index
      %144 = vector.load %arg21[%c0_81, %c0_82] : memref<64x16xf32, #tpu.memory_space<vmem>>, vector<64x16xf32>
      tpu.vector_store %arg21[%c0_81, %c0_82], %143 {strides = array<i32>} : memref<64x16xf32, #tpu.memory_space<vmem>>, vector<64x16xf32>,
      %c0_83 = arith.constant 0 : index
      %c0_84 = arith.constant 0 : index
      %145 = vector.load %arg4[%c0_83, %c0_84] : memref<64x16xbf16, #tpu.memory_space<vmem>>, vector<64x16xbf16>
      %146 = arith.extf %145 : vector<64x16xbf16> to vector<64x16xf32>
      %c0_85 = arith.constant 0 : index
      %c0_86 = arith.constant 0 : index
      %147 = vector.load %arg22[%c0_85, %c0_86] : memref<64x16xf32, #tpu.memory_space<vmem>>, vector<64x16xf32>
      tpu.vector_store %arg22[%c0_85, %c0_86], %146 {strides = array<i32>} : memref<64x16xf32, #tpu.memory_space<vmem>>, vector<64x16xf32>,
      %c0_87 = arith.constant 0 : index
      %c0_88 = arith.constant 0 : index
      %148 = vector.load %arg5[%c0_87, %c0_88] : memref<16x64xbf16, #tpu.memory_space<vmem>>, vector<16x64xbf16>
      %149 = arith.extf %148 : vector<16x64xbf16> to vector<16x64xf32>
      %c0_89 = arith.constant 0 : index
      %c0_90 = arith.constant 0 : index
      %150 = vector.load %arg23[%c0_89, %c0_90] : memref<16x64xf32, #tpu.memory_space<vmem>>, vector<16x64xf32>
      tpu.vector_store %arg23[%c0_89, %c0_90], %149 {strides = array<i32>} : memref<16x64xf32, #tpu.memory_space<vmem>>, vector<16x64xf32>,
    } else {
    }
    %c0 = arith.constant 0 : index
    %c0_1 = arith.constant 0 : index
    %3 = vector.load %arg19[%c0, %c0_1] : memref<16x128xf32, #tpu.memory_space<vmem>>, vector<16x128xf32>
    %c0_2 = arith.constant 0 : index
    %c0_3 = arith.constant 0 : index
    %4 = vector.load %arg20[%c0_2, %c0_3] : memref<64x128xf32, #tpu.memory_space<vmem>>, vector<64x128xf32>
    %5 = vector.extract_strided_slice %3 {offsets = [0, 0], sizes = [16, 32], strides = [1, 1]} : vector<16x128xf32> to vector<16x32xf32>
    %6 = vector.extract_strided_slice %4 {offsets = [0, 0], sizes = [64, 32], strides = [1, 1]} : vector<64x128xf32> to vector<64x32xf32>
    %c0_4 = arith.constant 0 : index
    %c0_5 = arith.constant 0 : index
    %7 = vector.load %arg21[%c0_4, %c0_5] : memref<64x16xf32, #tpu.memory_space<vmem>>, vector<64x16xf32>
    %c0_6 = arith.constant 0 : index
    %c0_7 = arith.constant 0 : index
    %8 = vector.load %arg22[%c0_6, %c0_7] : memref<64x16xf32, #tpu.memory_space<vmem>>, vector<64x16xf32>
    %c0_8 = arith.constant 0 : index
    %c0_9 = arith.constant 0 : index
    %9 = vector.load %arg23[%c0_8, %c0_9] : memref<16x64xf32, #tpu.memory_space<vmem>>, vector<16x64xf32>
    %c0_10 = arith.constant 0 : index
    %c0_11 = arith.constant 0 : index
    %c0_12 = arith.constant 0 : index
    %10 = vector.load %arg10[%c0_10, %c0_11, %c0_12] : memref<1x32x512xf32, #tpu.memory_space<vmem>>, vector<1x32x512xf32>
    %11 = vector.shape_cast %10 : vector<1x32x512xf32> to vector<32x512xf32>
    %cst = arith.constant dense<0.000000e+00> : vector<16x512xf32>
    %12 = tpu.matmul %5, %11, %cst {dimension_numbers = #tpu.dot_dimension_numbers<[1], [0], [0], [1], [0, 0, 1, 1], [], []>} : vector<16x32xf32>, vector<32x512xf32>, vector<16x512xf32> -> vector<16x512xf32>
    %c0_13 = arith.constant 0 : index
    %c0_14 = arith.constant 0 : index
    %c0_15 = arith.constant 0 : index
    %13 = vector.load %arg11[%c0_13, %c0_14, %c0_15] : memref<1x1x512xf32, #tpu.memory_space<vmem>>, vector<1x1x512xf32>
    %14 = vector.shape_cast %13 : vector<1x1x512xf32> to vector<1x512xf32>
    %15 = vector.broadcast %14 : vector<1x512xf32> to vector<16x512xf32>
    %16 = arith.addf %12, %15 : vector<16x512xf32>
    %17 = vector.extract_strided_slice %16 {offsets = [0, 0], sizes = [16, 128], strides = [1, 1]} : vector<16x512xf32> to vector<16x128xf32>
    %18 = vector.extract_strided_slice %16 {offsets = [0, 128], sizes = [16, 128], strides = [1, 1]} : vector<16x512xf32> to vector<16x128xf32>
    %19 = vector.extract_strided_slice %16 {offsets = [0, 256], sizes = [16, 128], strides = [1, 1]} : vector<16x512xf32> to vector<16x128xf32>
    %20 = vector.extract_strided_slice %16 {offsets = [0, 384], sizes = [16, 128], strides = [1, 1]} : vector<16x512xf32> to vector<16x128xf32>
    %c0_16 = arith.constant 0 : index
    %c0_17 = arith.constant 0 : index
    %c0_18 = arith.constant 0 : index
    %21 = vector.load %arg12[%c0_16, %c0_17, %c0_18] : memref<1x32x128xf32, #tpu.memory_space<vmem>>, vector<1x32x128xf32>
    %22 = vector.shape_cast %21 : vector<1x32x128xf32> to vector<32x128xf32>
    %cst_19 = arith.constant dense<0.000000e+00> : vector<64x128xf32>
    %23 = tpu.matmul %6, %22, %cst_19 {dimension_numbers = #tpu.dot_dimension_numbers<[1], [0], [0], [1], [0, 0, 1, 1], [], []>} : vector<64x32xf32>, vector<32x128xf32>, vector<64x128xf32> -> vector<64x128xf32>
    %c0_20 = arith.constant 0 : index
    %c0_21 = arith.constant 0 : index
    %c0_22 = arith.constant 0 : index
    %24 = vector.load %arg13[%c0_20, %c0_21, %c0_22] : memref<1x1x128xf32, #tpu.memory_space<vmem>>, vector<1x1x128xf32>
    %25 = vector.shape_cast %24 : vector<1x1x128xf32> to vector<1x128xf32>
    %26 = vector.broadcast %25 : vector<1x128xf32> to vector<64x128xf32>
    %27 = arith.addf %23, %26 : vector<64x128xf32>
    %cst_23 = arith.constant dense<0.000000e+00> : vector<64x128xf32>
    %28 = tpu.matmul %7, %19, %cst_23 {dimension_numbers = #tpu.dot_dimension_numbers<[1], [0], [0], [1], [0, 0, 1, 1], [], []>} : vector<64x16xf32>, vector<16x128xf32>, vector<64x128xf32> -> vector<64x128xf32>
    %cst_24 = arith.constant dense<0.000000e+00> : vector<64x128xf32>
    %29 = tpu.matmul %8, %20, %cst_24 {dimension_numbers = #tpu.dot_dimension_numbers<[1], [0], [0], [1], [0, 0, 1, 1], [], []>} : vector<64x16xf32>, vector<16x128xf32>, vector<64x128xf32> -> vector<64x128xf32>
    %30 = arith.addf %27, %28 : vector<64x128xf32>
    %31 = arith.addf %30, %29 : vector<64x128xf32>
    %c0_25 = arith.constant 0 : index
    %c0_26 = arith.constant 0 : index
    %c0_27 = arith.constant 0 : index
    %32 = vector.load %arg16[%c0_25, %c0_26, %c0_27] : memref<1x1x128xf32, #tpu.memory_space<vmem>>, vector<1x1x128xf32>
    %33 = vector.shape_cast %32 : vector<1x1x128xf32> to vector<1x128xf32>
    %c0_28 = arith.constant 0 : index
    %c0_29 = arith.constant 0 : index
    %c0_30 = arith.constant 0 : index
    %34 = vector.load %arg17[%c0_28, %c0_29, %c0_30] : memref<1x1x128xf32, #tpu.memory_space<vmem>>, vector<1x1x128xf32>
    %35 = vector.shape_cast %34 : vector<1x1x128xf32> to vector<1x128xf32>
    %cst_31 = arith.constant dense<0.000000e+00> : vector<128xf32>
    %36 = vector.multi_reduction <add>, %31, %cst_31 [0] : vector<64x128xf32> to vector<128xf32>
    %37 = vector.shape_cast %36 : vector<128xf32> to vector<1x128xf32>
    %cst_32 = arith.constant 6.400000e+01 : f32
    %38 = vector.broadcast %cst_32 : f32 to vector<1x128xf32>
    %39 = arith.divf %37, %38 : vector<1x128xf32>
    %40 = arith.mulf %31, %31 : vector<64x128xf32>
    %cst_33 = arith.constant dense<0.000000e+00> : vector<128xf32>
    %41 = vector.multi_reduction <add>, %40, %cst_33 [0] : vector<64x128xf32> to vector<128xf32>
    %42 = vector.shape_cast %41 : vector<128xf32> to vector<1x128xf32>
    %cst_34 = arith.constant 6.400000e+01 : f32
    %43 = vector.broadcast %cst_34 : f32 to vector<1x128xf32>
    %44 = arith.divf %42, %43 : vector<1x128xf32>
    %45 = arith.mulf %39, %39 : vector<1x128xf32>
    %46 = arith.subf %44, %45 : vector<1x128xf32>
    %cst_35 = arith.constant 0.000000e+00 : f32
    %47 = vector.broadcast %cst_35 : f32 to vector<1x128xf32>
    %48 = arith.maximumf %46, %47 : vector<1x128xf32>
    %49 = vector.broadcast %39 : vector<1x128xf32> to vector<64x128xf32>
    %50 = arith.subf %31, %49 : vector<64x128xf32>
    %cst_36 = arith.constant 9.99999974E-6 : f32
    %51 = vector.broadcast %cst_36 : f32 to vector<1x128xf32>
    %52 = arith.addf %48, %51 : vector<1x128xf32>
    %53 = math.rsqrt %52 : vector<1x128xf32>
    %54 = vector.broadcast %53 : vector<1x128xf32> to vector<64x128xf32>
    %55 = arith.mulf %50, %54 : vector<64x128xf32>
    %56 = vector.broadcast %33 : vector<1x128xf32> to vector<64x128xf32>
    %57 = arith.mulf %55, %56 : vector<64x128xf32>
    %58 = vector.broadcast %35 : vector<1x128xf32> to vector<64x128xf32>
    %59 = arith.addf %57, %58 : vector<64x128xf32>
    %60 = arith.negf %59 : vector<64x128xf32>
    %61 = math.exp %60 : vector<64x128xf32>
    %cst_37 = arith.constant 1.000000e+00 : f32
    %62 = vector.broadcast %cst_37 : f32 to vector<64x128xf32>
    %63 = arith.addf %62, %61 : vector<64x128xf32>
    %64 = arith.divf %62, %63 : vector<64x128xf32>
    %65 = arith.mulf %59, %64 : vector<64x128xf32>
    %66 = arith.addf %4, %65 : vector<64x128xf32>
    %c0_38 = arith.constant 0 : index
    %c0_39 = arith.constant 0 : index
    %67 = vector.load %arg20[%c0_38, %c0_39] : memref<64x128xf32, #tpu.memory_space<vmem>>, vector<64x128xf32>
    tpu.vector_store %arg20[%c0_38, %c0_39], %66 {strides = array<i32>} : memref<64x128xf32, #tpu.memory_space<vmem>>, vector<64x128xf32>,
    %c2_i32 = arith.constant 2 : i32
    %68 = arith.cmpi eq, %arg0, %c2_i32 : i32
    %69 = arith.extui %68 : i1 to i32
    %c0_i32_40 = arith.constant 0 : i32
    %70 = arith.cmpi ne, %69, %c0_i32_40 : i32
    scf.if %70 {
      %116 = vector.extract_strided_slice %66 {offsets = [0, 0], sizes = [64, 32], strides = [1, 1]} : vector<64x128xf32> to vector<64x32xf32>
      %c0_59 = arith.constant 0 : index
      %c0_60 = arith.constant 0 : index
      %117 = vector.load %arg18[%c0_59, %c0_60] : memref<64x32xf32, #tpu.memory_space<vmem>>, vector<64x32xf32>
      tpu.vector_store %arg18[%c0_59, %c0_60], %116 {strides = array<i32>} : memref<64x32xf32, #tpu.memory_space<vmem>>, vector<64x32xf32>,
    } else {
    }
    %cst_41 = arith.constant dense<0.000000e+00> : vector<64x128xf32>
    %71 = tpu.matmul %8, %18, %cst_41 {dimension_numbers = #tpu.dot_dimension_numbers<[1], [0], [0], [1], [0, 0, 1, 1], [], []>} : vector<64x16xf32>, vector<16x128xf32>, vector<64x128xf32> -> vector<64x128xf32>
    %72 = arith.negf %4 : vector<64x128xf32>
    %73 = math.exp %72 : vector<64x128xf32>
    %cst_42 = arith.constant 1.000000e+00 : f32
    %74 = vector.broadcast %cst_42 : f32 to vector<64x128xf32>
    %75 = arith.addf %74, %73 : vector<64x128xf32>
    %76 = arith.divf %74, %75 : vector<64x128xf32>
    %77 = arith.mulf %76, %71 : vector<64x128xf32>
    %cst_43 = arith.constant dense<0.000000e+00> : vector<16x128xf32>
    %78 = tpu.matmul %9, %77, %cst_43 {dimension_numbers = #tpu.dot_dimension_numbers<[1], [0], [0], [1], [0, 0, 1, 1], [], []>} : vector<16x64xf32>, vector<64x128xf32>, vector<16x128xf32> -> vector<16x128xf32>
    %79 = arith.addf %17, %78 : vector<16x128xf32>
    %c0_44 = arith.constant 0 : index
    %c0_45 = arith.constant 0 : index
    %c0_46 = arith.constant 0 : index
    %80 = vector.load %arg14[%c0_44, %c0_45, %c0_46] : memref<1x1x128xf32, #tpu.memory_space<vmem>>, vector<1x1x128xf32>
    %81 = vector.shape_cast %80 : vector<1x1x128xf32> to vector<1x128xf32>
    %c0_47 = arith.constant 0 : index
    %c0_48 = arith.constant 0 : index
    %c0_49 = arith.constant 0 : index
    %82 = vector.load %arg15[%c0_47, %c0_48, %c0_49] : memref<1x1x128xf32, #tpu.memory_space<vmem>>, vector<1x1x128xf32>
    %83 = vector.shape_cast %82 : vector<1x1x128xf32> to vector<1x128xf32>
    %cst_50 = arith.constant dense<0.000000e+00> : vector<128xf32>
    %84 = vector.multi_reduction <add>, %79, %cst_50 [0] : vector<16x128xf32> to vector<128xf32>
    %85 = vector.shape_cast %84 : vector<128xf32> to vector<1x128xf32>
    %cst_51 = arith.constant 1.600000e+01 : f32
    %86 = vector.broadcast %cst_51 : f32 to vector<1x128xf32>
    %87 = arith.divf %85, %86 : vector<1x128xf32>
    %88 = arith.mulf %79, %79 : vector<16x128xf32>
    %cst_52 = arith.constant dense<0.000000e+00> : vector<128xf32>
    %89 = vector.multi_reduction <add>, %88, %cst_52 [0] : vector<16x128xf32> to vector<128xf32>
    %90 = vector.shape_cast %89 : vector<128xf32> to vector<1x128xf32>
    %cst_53 = arith.constant 1.600000e+01 : f32
    %91 = vector.broadcast %cst_53 : f32 to vector<1x128xf32>
    %92 = arith.divf %90, %91 : vector<1x128xf32>
    %93 = arith.mulf %87, %87 : vector<1x128xf32>
    %94 = arith.subf %92, %93 : vector<1x128xf32>
    %cst_54 = arith.constant 0.000000e+00 : f32
    %95 = vector.broadcast %cst_54 : f32 to vector<1x128xf32>
    %96 = arith.maximumf %94, %95 : vector<1x128xf32>
    %97 = vector.broadcast %87 : vector<1x128xf32> to vector<16x128xf32>
    %98 = arith.subf %79, %97 : vector<16x128xf32>
    %cst_55 = arith.constant 9.99999974E-6 : f32
    %99 = vector.broadcast %cst_55 : f32 to vector<1x128xf32>
    %100 = arith.addf %96, %99 : vector<1x128xf32>
    %101 = math.rsqrt %100 : vector<1x128xf32>
    %102 = vector.broadcast %101 : vector<1x128xf32> to vector<16x128xf32>
    %103 = arith.mulf %98, %102 : vector<16x128xf32>
    %104 = vector.broadcast %81 : vector<1x128xf32> to vector<16x128xf32>
    %105 = arith.mulf %103, %104 : vector<16x128xf32>
    %106 = vector.broadcast %83 : vector<1x128xf32> to vector<16x128xf32>
    %107 = arith.addf %105, %106 : vector<16x128xf32>
    %108 = arith.negf %107 : vector<16x128xf32>
    %109 = math.exp %108 : vector<16x128xf32>
    %cst_56 = arith.constant 1.000000e+00 : f32
    %110 = vector.broadcast %cst_56 : f32 to vector<16x128xf32>
    %111 = arith.addf %110, %109 : vector<16x128xf32>
    %112 = arith.divf %110, %111 : vector<16x128xf32>
    %113 = arith.mulf %107, %112 : vector<16x128xf32>
    %114 = arith.addf %3, %113 : vector<16x128xf32>
    %c0_57 = arith.constant 0 : index
    %c0_58 = arith.constant 0 : index
    %115 = vector.load %arg19[%c0_57, %c0_58] : memref<16x128xf32, #tpu.memory_space<vmem>>, vector<16x128xf32>
    tpu.vector_store %arg19[%c0_57, %c0_58], %114 {strides = array<i32>} : memref<16x128xf32, #tpu.memory_space<vmem>>, vector<16x128xf32>,
    return
  }
  func.func @transform_0(%arg0: i32) -> (i32, i32) {
    %c0_i32 = arith.constant 0 : i32
    %c0_i32_0 = arith.constant 0 : i32
    %c0_i32_1 = arith.constant 0 : i32
    return %c0_i32, %c0_i32_0 : i32, i32
  }
  func.func @transform_1(%arg0: i32) -> (i32, i32) {
    %c0_i32 = arith.constant 0 : i32
    %c0_i32_0 = arith.constant 0 : i32
    %c0_i32_1 = arith.constant 0 : i32
    return %c0_i32, %c0_i32_0 : i32, i32
  }
  func.func @transform_2(%arg0: i32) -> (i32, i32) {
    %c0_i32 = arith.constant 0 : i32
    %c0_i32_0 = arith.constant 0 : i32
    %c0_i32_1 = arith.constant 0 : i32
    return %c0_i32, %c0_i32_0 : i32, i32
  }
  func.func @transform_3(%arg0: i32) -> (i32, i32) {
    %c0_i32 = arith.constant 0 : i32
    %c0_i32_0 = arith.constant 0 : i32
    %c0_i32_1 = arith.constant 0 : i32
    return %c0_i32, %c0_i32_0 : i32, i32
  }
  func.func @transform_4(%arg0: i32) -> (i32, i32) {
    %c0_i32 = arith.constant 0 : i32
    %c0_i32_0 = arith.constant 0 : i32
    %c0_i32_1 = arith.constant 0 : i32
    return %c0_i32, %c0_i32_0 : i32, i32
  }
  func.func @transform_5(%arg0: i32) -> (i32, i32) {
    %c0_i32 = arith.constant 0 : i32
    %c0_i32_0 = arith.constant 0 : i32
    %c0_i32_1 = arith.constant 0 : i32
    return %c0_i32, %c0_i32_0 : i32, i32
  }
  func.func @transform_6(%arg0: i32) -> (i32, i32) {
    %c0_i32 = arith.constant 0 : i32
    %c0_i32_0 = arith.constant 0 : i32
    %c0_i32_1 = arith.constant 0 : i32
    return %c0_i32, %c0_i32_0 : i32, i32
  }
  func.func @transform_7(%arg0: i32) -> (i32, i32) {
    %c0_i32 = arith.constant 0 : i32
    %c0_i32_0 = arith.constant 0 : i32
    %c0_i32_1 = arith.constant 0 : i32
    return %c0_i32, %c0_i32_0 : i32, i32
  }
  func.func @transform_8(%arg0: i32) -> (i32, i32) {
    %c0_i32 = arith.constant 0 : i32
    %c0_i32_0 = arith.constant 0 : i32
    %c0_i32_1 = arith.constant 0 : i32
    return %c0_i32, %c0_i32_0 : i32, i32
  }
  func.func @transform_9(%arg0: i32) -> (i32, i32, i32) {
    %c0_i32 = arith.constant 0 : i32
    %c0_i32_0 = arith.constant 0 : i32
    %c0_i32_1 = arith.constant 0 : i32
    return %arg0, %c0_i32, %c0_i32_0 : i32, i32, i32
  }
  func.func @transform_10(%arg0: i32) -> (i32, i32, i32) {
    %c0_i32 = arith.constant 0 : i32
    %c0_i32_0 = arith.constant 0 : i32
    %c0_i32_1 = arith.constant 0 : i32
    return %arg0, %c0_i32, %c0_i32_0 : i32, i32, i32
  }
  func.func @transform_11(%arg0: i32) -> (i32, i32, i32) {
    %c0_i32 = arith.constant 0 : i32
    %c0_i32_0 = arith.constant 0 : i32
    %c0_i32_1 = arith.constant 0 : i32
    return %arg0, %c0_i32, %c0_i32_0 : i32, i32, i32
  }
  func.func @transform_12(%arg0: i32) -> (i32, i32, i32) {
    %c0_i32 = arith.constant 0 : i32
    %c0_i32_0 = arith.constant 0 : i32
    %c0_i32_1 = arith.constant 0 : i32
    return %arg0, %c0_i32, %c0_i32_0 : i32, i32, i32
  }
  func.func @transform_13(%arg0: i32) -> (i32, i32, i32) {
    %c0_i32 = arith.constant 0 : i32
    %c0_i32_0 = arith.constant 0 : i32
    %c0_i32_1 = arith.constant 0 : i32
    return %arg0, %c0_i32, %c0_i32_0 : i32, i32, i32
  }
  func.func @transform_14(%arg0: i32) -> (i32, i32, i32) {
    %c0_i32 = arith.constant 0 : i32
    %c0_i32_0 = arith.constant 0 : i32
    %c0_i32_1 = arith.constant 0 : i32
    return %arg0, %c0_i32, %c0_i32_0 : i32, i32, i32
  }
  func.func @transform_15(%arg0: i32) -> (i32, i32, i32) {
    %c0_i32 = arith.constant 0 : i32
    %c0_i32_0 = arith.constant 0 : i32
    %c0_i32_1 = arith.constant 0 : i32
    return %arg0, %c0_i32, %c0_i32_0 : i32, i32, i32
  }
  func.func @transform_16(%arg0: i32) -> (i32, i32, i32) {
    %c0_i32 = arith.constant 0 : i32
    %c0_i32_0 = arith.constant 0 : i32
    %c0_i32_1 = arith.constant 0 : i32
    return %arg0, %c0_i32, %c0_i32_0 : i32, i32, i32
  }
  func.func @transform_17(%arg0: i32) -> (i32, i32) {
    %c0_i32 = arith.constant 0 : i32
    %c0_i32_0 = arith.constant 0 : i32
    %c0_i32_1 = arith.constant 0 : i32
    return %c0_i32, %c0_i32_0 : i32, i32
  }
}

</mosaic_0001>

<bundles_post_ra>
// kernel: emb_net_pallas.1
= control target key start
LH: loop header
LB: loop body
LE: loop exit
PB: predicated region body
PF: predicated region fallthrough
CT: control target
= control target key end

     0   :  { %s2850_s24 = smov 0   ;;  %s3276_s0 = inlined_call_operand.vmem [shape: f32[16,8], index: 0, kind: input, shape index: {}]   ;;  %s3277_s1 = inlined_call_operand.vmem [shape: f32[64,8], index: 1, kind: input, shape index: {}]   ;;  %s3278_s2 = inlined_call_operand.vmem [shape: bf16[64,16], index: 2, kind: input, shape index: {}]   ;;  %s3279_s3 = inlined_call_operand.vmem [shape: bf16[64,16], index: 3, kind: input, shape index: {}]   ;;  %s3280_s4 = inlined_call_operand.vmem [shape: bf16[16,64], index: 4, kind: input, shape index: {}]   ;;  %s3281_s5 = inlined_call_operand.vmem [shape: f32[8,128], index: 5, kind: input, shape index: {}]   ;;  %s3282_s6 = inlined_call_operand.vmem [shape: f32[1,128], index: 6, kind: input, shape index: {}]   ;;  %s3283_s7 = inlined_call_operand.vmem [shape: f32[8,128], index: 7, kind: input, shape index: {}]   ;;  %s3284_s8 = inlined_call_operand.vmem [shape: f32[1,128], index: 8, kind: input, shape index: {}]   ;;  %s3285_s9 = inlined_call_operand.vmem [shape: f32[3,32,512], index: 9, kind: input, shape index: {}]   ;;  %s3286_s10 = inlined_call_operand.vmem [shape: f32[3,1,512], index: 10, kind: input, shape index: {}]   ;;  %s3287_s11 = inlined_call_operand.vmem [shape: f32[3,32,128], index: 11, kind: input, shape index: {}]   ;;  %s3288_s12 = inlined_call_operand.vmem [shape: f32[3,1,128], index: 12, kind: input, shape index: {}]   ;;  %s3289_s13 = inlined_call_operand.vmem [shape: f32[3,1,128], index: 13, kind: input, shape index: {}]   ;;  %s3290_s14 = inlined_call_operand.vmem [shape: f32[3,1,128], index: 14, kind: input, shape index: {}]   ;;  %s3291_s15 = inlined_call_operand.vmem [shape: f32[3,1,128], index: 15, kind: input, shape index: {}]   ;;  %s3292_s16 = inlined_call_operand.vmem [shape: f32[3,1,128], index: 16, kind: input, shape index: {}]   ;;  %s3293_s17 = inlined_call_operand.vmem [shape: f32[64,32], index: 17, kind: output, shape index: {}]  }
   0x1   :  { %3298 = sst [smem:[#allocation8_spill]] %s3276_s0 }
   0x2   :  { %3299 = sst [smem:[#allocation9_spill]] %s3277_s1 }
   0x3   :  { %3300 = sst [smem:[#allocation10_spill]] %s3280_s4 }
   0x4   :  { %3301 = sst [smem:[#allocation11_spill]] %s3282_s6 }
   0x5   :  { %3302 = sst [smem:[#allocation12_spill]] %s3284_s8 }
   0x6   :  { %3303 = sst [smem:[#allocation13_spill]] %s3285_s9 }
   0x7   :  { %3304 = sst [smem:[#allocation14_spill]] %s3286_s10 }
   0x8   :  { %3305 = sst [smem:[#allocation15_spill]] %s3293_s17 }
   0x9 LB: > { %3306 = sst [smem:[#allocation7_spill]] %s2757_s24  ;;  %s2856_s25 = sadd.s32 4294967295, %s2757_s24   ;;  %s2757_s24 = sphi %s2850_s24, %s27_s24  }
   0xa   : > { %p2241_p0 = scmp.ge.s32.totalorder %s2757_s24, 1  ;;  %p541_p1 = scmp.lt.s32.totalorder %s2757_s24, 4 }
   0xc   : > { %p542_p2 = pnand %p2241_p0, %p541_p1 }
   0xd   : > { %p612_p3 = scmp.lt.s32.totalorder (!%p542_p2), %s2856_s25, 2  ;;  %s3307_s9 = sld [smem:[#allocation13_spill]] (!%p542_p2) }
   0xe   : > { %545 = sbr.rel (%p542_p2) target bundleno = 1375 (0x55f), region = 88  ;;  %s3308_s10 = sld [smem:[#allocation14_spill]] (!%p542_p2) }
   0xf   : > { %p2247_p4 = scmp.ne.s32.totalorder (!%p542_p2), %s2856_s25, 0 }
  0x15   : > { %s2862_s26 = scalar_select %p612_p3, %s2856_s25, 2 }
  0x16   : > { %644 = sbr.rel (%p2247_p4) target bundleno = 288 (0x120), region = 92  ;;  %v647_v0 = vld [vmem:[%s3281_s5] sm:$0xff] (!%p2247_p4)  ;;  %s3309_s0 = sld [smem:[#allocation8_spill]] (!%p2247_p4)  ;;  %vm655_vm0 = vcmask (!%p2247_p4), 64512   ;;  %v2372_v13 = vld [vmem:[%s3278_s2 + $0x8] sm:$0xff] (!%p2247_p4)   ;;  %v2373_v14 = vld [vmem:[%s3278_s2 + $0x10] sm:$0xff] (!%p2247_p4)  }
  0x17   : > { %s2334_s27 = sshll.u32 %s2862_s26, 7  ;;  %s2244_s28 = sshll.u32 %s2862_s26, 2  ;;  %v761_v1 = vld [vmem:[%s3283_s7] sm:$0xff] (!%p2247_p4)  ;;  %2442 = vmatprep.subr.mxu0 (!%p2247_p4), %v647_v0  ;;  %v2342_v17 = vunpack.c.l.bf16 (!%p2247_p4), %v2372_v13  ;;  %v2343_v18 = vunpack.c.h.bf16 (!%p2247_p4), %v2372_v13  ;;  %v2374_v19 = vld [vmem:[%s3278_s2 + $0x18] sm:$0xff] (!%p2247_p4)   ;;  %v2375_v21 = vld [vmem:[%s3279_s3 + $0x8] sm:$0xff] (!%p2247_p4)   ;;  %v2346_v22 = vunpack.c.l.bf16 (!%p2247_p4), %v2373_v14  ;;  %v2347_v23 = vunpack.c.h.bf16 (!%p2247_p4), %v2373_v14 }
  0x18   : > { %s2869_s30 = scalar_lea.vmem %s3307_s9, %s2334_s27  ;;  %s2874_s1 = scalar_lea.vmem %s3308_s10, %s2244_s28  ;;  %2600 = vmatprep.subr.mxu1 (!%p2247_p4), %v761_v1  ;;  %2443 = vmatpush3.msra.mxu0 (!%p2247_p4), %v647_v0  ;;  %v2337_v12 = vld [vmem:[%s3278_s2] sm:$0xff] (!%p2247_p4)   ;;  %v2350_v24 = vunpack.c.l.bf16 (!%p2247_p4), %v2374_v19  ;;  %v2351_v25 = vunpack.c.h.bf16 (!%p2247_p4), %v2374_v19  ;;  %v2376_v26 = vld [vmem:[%s3279_s3 + $0x10] sm:$0xff] (!%p2247_p4)   ;;  %v2377_v27 = vld [vmem:[%s3279_s3 + $0x18] sm:$0xff] (!%p2247_p4)   ;;  %vm978_vm1 = vcmask (!%p2247_p4), 130048   ;;  %v2358_v31 = vunpack.c.l.bf16 (!%p2247_p4), %v2375_v21 }
  0x19   : > { %s2335_s20 = sshll.u32 %s2862_s26, 5  ;;  %s628_s23 = scalar_lea.vmem %s3288_s12, %s2862_s26  ;;  %2601 = vmatpush3.msra.mxu1 (!%p2247_p4), %v761_v1  ;;  %2447 = vmatprep.subr.mxu0 (!%p2247_p4), %v761_v1  ;;  %v2338_v15 = vunpack.c.l.bf16 (!%p2247_p4), %v2337_v12  ;;  %v2339_v16 = vunpack.c.h.bf16 (!%p2247_p4), %v2337_v12  ;;  %v2353_v20 = vld [vmem:[%s3279_s3] sm:$0xff] (!%p2247_p4)   ;;  %981 = vst.msk [vmem:[#allocation4 + $0x10] sm:$0xff] (!%p2247_p4), %vm978_vm1, %v2342_v17  ;;  %982 = vst.msk [vmem:[#allocation4 + $0x18] sm:$0xff] (!%p2247_p4), %vm978_vm1, %v2343_v18  ;;  %v2359_v32 = vunpack.c.h.bf16 (!%p2247_p4), %v2375_v21  ;;  %v2362_v33 = vunpack.c.l.bf16 (!%p2247_p4), %v2376_v26 }
  0x1a   : > { %s2884_s8 = scalar_lea.vmem %s3287_s11, %s2335_s20  ;;  %s631_s27 = scalar_lea.vmem %s3289_s13, %s2862_s26  ;;  %v2354_v29 = vunpack.c.l.bf16 (!%p2247_p4), %v2353_v20  ;;  %v2355_v30 = vunpack.c.h.bf16 (!%p2247_p4), %v2353_v20  ;;  %983 = vst.msk [vmem:[#allocation4 + $0x20] sm:$0xff] (!%p2247_p4), %vm978_vm1, %v2346_v22  ;;  %984 = vst.msk [vmem:[#allocation4 + $0x28] sm:$0xff] (!%p2247_p4), %vm978_vm1, %v2347_v23  ;;  %v2363_v34 = vunpack.c.h.bf16 (!%p2247_p4), %v2376_v26  ;;  %v2366_v35 = vunpack.c.l.bf16 (!%p2247_p4), %v2377_v27 }
  0x1b   : > { %s637_s9 = scalar_lea.vmem %s3291_s15, %s2862_s26  ;;  %s640_s22 = scalar_lea.vmem %s3292_s16, %s2862_s26  ;;  %979 = vst.msk [vmem:[#allocation4] sm:$0xff] (!%p2247_p4), %vm978_vm1, %v2338_v15  ;;  %980 = vst.msk [vmem:[#allocation4 + $0x8] sm:$0xff] (!%p2247_p4), %vm978_vm1, %v2339_v16  ;;  %v2367_v36 = vunpack.c.h.bf16 (!%p2247_p4), %v2377_v27  ;;  %vm1015_vm2 = vcmask (!%p2247_p4), 523264  }
  0x1c   : > { %v645_v2 = vld [vmem:[%s3309_s0] sm:$0xff] (!%p2247_p4)  ;;  %s3310_s19 = sld [smem:[#allocation9_spill]] (!%p2247_p4)  ;;  %v646_v4 = vld [vmem:[%s3309_s0 + $0x8] sm:$0xff] (!%p2247_p4)  ;;  %s3311_s4 = sld [smem:[#allocation10_spill]] (!%p2247_p4)  ;;  %985 = vst.msk [vmem:[#allocation4 + $0x30] sm:$0xff] (!%p2247_p4), %vm978_vm1, %v2350_v24  ;;  %986 = vst.msk [vmem:[#allocation4 + $0x38] sm:$0xff] (!%p2247_p4), %vm978_vm1, %v2351_v25 }
  0x1d   : > { %2444 = vmatprep.mubr.msk.f32.mxu0 %vm655_vm0, %v645_v2  ;;  %1003 = vst.msk [vmem:[#allocation5] sm:$0xff] %vm978_vm1, %v2354_v29  ;;  %1004 = vst.msk [vmem:[#allocation5 + $0x8] sm:$0xff] %vm978_vm1, %v2355_v30  ;;  %s3312_s29 = sld [smem:[#allocation11_spill]]  ;;  %s3313_s28 = sld [smem:[#allocation12_spill]] }
  0x1e   : > { %2445 = vmatmul.mubr.msk.f32.vlgmr.msra.gmra.mrb[0].mxu0 %vm655_vm0, %v646_v4  ;;  %1005 = vst.msk [vmem:[#allocation5 + $0x10] sm:$0xff] %vm978_vm1, %v2358_v31  ;;  %1006 = vst.msk [vmem:[#allocation5 + $0x18] sm:$0xff] %vm978_vm1, %v2359_v32 }
  0x1f   : > { %2448 = vmatpush3.msra.mxu0 %v761_v1  ;;  %1007 = vst.msk [vmem:[#allocation5 + $0x20] sm:$0xff] %vm978_vm1, %v2362_v33  ;;  %1008 = vst.msk [vmem:[#allocation5 + $0x28] sm:$0xff] %vm978_vm1, %v2363_v34 }
  0x20   : > { %1009 = vst.msk [vmem:[#allocation5 + $0x30] sm:$0xff] %vm978_vm1, %v2366_v35  ;;  %1010 = vst.msk [vmem:[#allocation5 + $0x38] sm:$0xff] %vm978_vm1, %v2367_v36 }
  0x22   : > { %v755_v3 = vld [vmem:[%s3310_s19 + $0x10] sm:$0xff]  ;;  %v756_v5 = vld [vmem:[%s3310_s19 + $0x18] sm:$0xff]  ;;  %v753_v6 = vld [vmem:[%s3310_s19] sm:$0xff] }
  0x23   : > { %2452 = vmatprep.mubr.msk.f32.mxu1 %vm655_vm0, %v755_v3  ;;  %v757_v7 = vld [vmem:[%s3310_s19 + $0x20] sm:$0xff]  ;;  %2449 = vmatprep.mubr.msk.f32.mxu0 %vm655_vm0, %v753_v6  ;;  %v754_v8 = vld [vmem:[%s3310_s19 + $0x8] sm:$0xff]  ;;  %v759_v10 = vld [vmem:[%s3310_s19 + $0x30] sm:$0xff] }
  0x24   : > { %2453 = vmatmul.mubr.msk.f32.vlgmr.msra.gmra.mrb[0].mxu1 %vm655_vm0, %v756_v5  ;;  %v758_v9 = vld [vmem:[%s3310_s19 + $0x28] sm:$0xff]  ;;  %2450 = vmatmul.mubr.msk.f32.vlgmr.msra.gmra.mrb[2].mxu0 %vm655_vm0, %v754_v8  ;;  %v760_v11 = vld [vmem:[%s3310_s19 + $0x38] sm:$0xff]  ;;  %v2369_v28 = vld [vmem:[%s3311_s4] sm:$0xff]  }
  0x25   : > { %2455 = vmatprep.mubr.msk.f32.mxu1 %vm655_vm0, %v757_v7  ;;  %v2370_v37 = vunpack.c.l.bf16 %v2369_v28  ;;  %v2371_v38 = vunpack.c.h.bf16 %v2369_v28  ;;  %v2248_v39 = vld [vmem:[%s3312_s29] ss:$0 sm:$0xff] }
  0x26   : > { %v2253_v40 = vld [vmem:[%s3313_s28] ss:$0 sm:$0xff] }
  0x27   : > { %1016 = vst.msk [vmem:[#allocation6] sm:$0xff] %vm1015_vm2, %v2370_v37  ;;  %1017 = vst.msk [vmem:[#allocation6 + $0x8] sm:$0xff] %vm1015_vm2, %v2371_v38 }
  0x28   : > { %2456 = vmatmul.mubr.msk.f32.gmra.mrb[2].mxu1 %vm655_vm0, %v758_v9 }
  0x29   : > { %2458 = vmatprep.mubr.msk.f32.mxu1 %vm655_vm0, %v759_v10 }
  0x2c   : > { %2459 = vmatmul.mubr.msk.f32.gmra.mrb[4].mxu1 %vm655_vm0, %v760_v11 }
  0xf1   : > { %v2446_v41 = vpop.f32.mrb[0].mxu0 }
  0xf2   : > { %v2998_v43 = vadd.f32 %v2446_v41, %v2248_v39  ;;  %v728_v45 = vpop.f32.mrb[1].mxu0 }
  0xf3   : > { %v3002_v47 = vadd.f32 %v2248_v39, %v728_v45 }
  0xf4   : > { %v2252_v49 = vmul.f32 -1.442695, %v2998_v43 }
  0xf5   : > { %v2251_v51 = vmul.f32 -1.442695, %v3002_v47 }
  0xf6   : > { %2635 = vpow2.f32 %v2252_v49 }
  0xf7   : > { %v2454_v42 = vpop.f32.mrb[0].mxu1  ;;  %v2451_v53 = vpop.f32.mrb[2].mxu0 }
  0xf8   : > { %v3000_v44 = vadd.f32 %v2454_v42, %v2253_v40  ;;  %v869_v46 = vpop.f32.mrb[1].mxu1  ;;  %v3010_v55 = vadd.f32 %v2451_v53, %v2253_v40  ;;  %v859_v57 = vpop.f32.mrb[3].mxu0 }
  0xf9   : > { %v3004_v48 = vadd.f32 %v2253_v40, %v869_v46  ;;  %v3014_v59 = vadd.f32 %v2253_v40, %v859_v57 }
  0xfa   : > { %v2265_v50 = vmul.f32 -1.442695, %v3000_v44  ;;  %v2263_v61 = vmul.f32 -1.442695, %v3010_v55 }
  0xfb   : > { %v2264_v52 = vmul.f32 -1.442695, %v3004_v48  ;;  %v2457_v54 = vpop.f32.mrb[2].mxu1  ;;  %v2262_v63 = vmul.f32 -1.442695, %v3014_v59 }
  0xfc   : > { %v3012_v56 = vadd.f32 %v2457_v54, %v2253_v40  ;;  %v879_v58 = vpop.f32.mrb[3].mxu1  ;;  %2637 = vpow2.f32 %v2265_v50 }
  0xfd   : > { %v3016_v60 = vadd.f32 %v2253_v40, %v879_v58  ;;  %2639 = vpow2.f32 %v2251_v51 }
  0xfe   : > { %v2267_v62 = vmul.f32 -1.442695, %v3012_v56  ;;  %2641 = vpow2.f32 %v2264_v52 }
  0xff   : > { %v2266_v0 = vmul.f32 -1.442695, %v3016_v60  ;;  %v2460_v1 = vpop.f32.mrb[4].mxu1  ;;  %2643 = vpow2.f32 %v2263_v61 }
 0x100   : > { %v3022_v2 = vadd.f32 %v2460_v1, %v2253_v40  ;;  %v889_v3 = vpop.f32.mrb[5].mxu1  ;;  %2645 = vpow2.f32 %v2267_v62  ;;  %v2636_v7 = vpop.eup %2635 }
 0x101   : > { %v3024_v4 = vadd.f32 %v2253_v40, %v889_v3  ;;  %2647 = vpow2.f32 %v2262_v63  ;;  %v744_v9 = vadd.f32 1.0, %v2636_v7 }
 0x102   : > { %v2269_v5 = vmul.f32 -1.442695, %v3022_v2  ;;  %2649 = vpow2.f32 %v2266_v0 }
 0x103   : > { %v2268_v6 = vmul.f32 -1.442695, %v3024_v4 }
 0x104   : > { %2651 = vpow2.f32 %v2269_v5 }
 0x105   : > { %2653 = vpow2.f32 %v2268_v6 }
 0x106   : > { %v2638_v8 = vpop.eup %2637  ;;  %2655 = vrcp.f32 %v744_v9 }
 0x107   : > { %v2640_v10 = vpop.eup %2639  ;;  %v925_v11 = vadd.f32 1.0, %v2638_v8 }
 0x108   : > { %v2642_v12 = vpop.eup %2641  ;;  %v743_v13 = vadd.f32 1.0, %v2640_v10 }
 0x109   : > { %v2644_v14 = vpop.eup %2643  ;;  %2657 = vrcp.f32 %v925_v11  ;;  %v924_v15 = vadd.f32 1.0, %v2642_v12 }
 0x10a   : > { %v2646_v16 = vpop.eup %2645  ;;  %2659 = vrcp.f32 %v743_v13  ;;  %v923_v17 = vadd.f32 1.0, %v2644_v14 }
 0x10b   : > { %v2648_v18 = vpop.eup %2647  ;;  %2661 = vrcp.f32 %v924_v15  ;;  %v927_v19 = vadd.f32 1.0, %v2646_v16 }
 0x10c   : > { %v2650_v20 = vpop.eup %2649  ;;  %2663 = vrcp.f32 %v923_v17  ;;  %v922_v21 = vadd.f32 1.0, %v2648_v18 }
 0x10d   : > { %2665 = vrcp.f32 %v927_v19  ;;  %v926_v23 = vadd.f32 1.0, %v2650_v20 }
 0x10e   : > { %v2652_v22 = vpop.eup %2651  ;;  %2667 = vrcp.f32 %v922_v21 }
 0x10f   : > { %v2654_v24 = vpop.eup %2653  ;;  %v929_v25 = vadd.f32 1.0, %v2652_v22  ;;  %2669 = vrcp.f32 %v926_v23 }
 0x110   : > { %v928_v26 = vadd.f32 1.0, %v2654_v24  ;;  %v2656_v27 = vpop.eup %2655 }
 0x111   : > { %2671 = vrcp.f32 %v929_v25  ;;  %v750_v29 = vmul.f32 %v2656_v27, %v2998_v43 }
 0x112   : > { %2673 = vrcp.f32 %v928_v26 }
 0x113   : > { %v2658_v28 = vpop.eup %2657  ;;  %752 = vst [vmem:[#allocation2 + $0x8] sm:$0xff] %v750_v29 }
 0x114   : > { %v2660_v30 = vpop.eup %2659  ;;  %v949_v31 = vmul.f32 %v2658_v28, %v3000_v44 }
 0x115   : > { %v2662_v32 = vpop.eup %2661  ;;  %v749_v33 = vmul.f32 %v2660_v30, %v3002_v47 }
 0x116   : > { %v2664_v34 = vpop.eup %2663  ;;  %957 = vst [vmem:[#allocation3 + $0x18] sm:$0xff] %v949_v31  ;;  %v948_v35 = vmul.f32 %v2662_v32, %v3004_v48 }
 0x117   : > { %v2666_v36 = vpop.eup %2665  ;;  %751 = vst [vmem:[#allocation2] sm:$0xff] %v749_v33  ;;  %v947_v37 = vmul.f32 %v2664_v34, %v3010_v55 }
 0x118   : > { %v2668_v38 = vpop.eup %2667  ;;  %956 = vst [vmem:[#allocation3 + $0x10] sm:$0xff] %v948_v35  ;;  %v951_v39 = vmul.f32 %v2666_v36, %v3012_v56 }
 0x119   : > { %v2670_v40 = vpop.eup %2669  ;;  %955 = vst [vmem:[#allocation3 + $0x8] sm:$0xff] %v947_v37  ;;  %v946_v41 = vmul.f32 %v2668_v38, %v3014_v59 }
 0x11a   : > { %959 = vst [vmem:[#allocation3 + $0x28] sm:$0xff] %v951_v39  ;;  %v950_v43 = vmul.f32 %v2670_v40, %v3016_v60 }
 0x11b   : > { %v2672_v42 = vpop.eup %2671  ;;  %954 = vst [vmem:[#allocation3] sm:$0xff] %v946_v41 }
 0x11c   : > { %v2674_v44 = vpop.eup %2673  ;;  %v953_v45 = vmul.f32 %v2672_v42, %v3022_v2  ;;  %958 = vst [vmem:[#allocation3 + $0x20] sm:$0xff] %v950_v43 }
 0x11d   : > { %v952_v46 = vmul.f32 %v2674_v44, %v3024_v4 }
 0x11e   : > { %961 = vst [vmem:[#allocation3 + $0x38] sm:$0xff] %v953_v45 }
 0x11f   : > { %960 = vst [vmem:[#allocation3 + $0x30] sm:$0xff] %v952_v46 }
 0x120 PF: > { %v1049_v47 = vld [vmem:[%s2869_s30 + $0x18] sm:$0xff]  ;;  %v1048_v49 = vld [vmem:[%s2869_s30 + $0x10] sm:$0xff]  ;;  %v2759_v54 = vmov 0.0   ;;  %v1047_v62 = vld [vmem:[%s2869_s30 + $0x8] sm:$0xff]  ;;  %vm1084_vm3 = vcmask 261120   ;;  %vm1385_vm4 = vcmask 130048   ;;  %v1064_v27 = vlaneseq }
 0x121   : > { %v1053_v48 = vld [vmem:[%s2869_s30 + $0x38] sm:$0xff]  ;;  %v1052_v51 = vld [vmem:[%s2869_s30 + $0x30] sm:$0xff]  ;;  %1232 = vmatprep.mubr.f32.mxu1 %v2759_v54  ;;  %1155 = vmatprep.mubr.f32.mxu0 %v2759_v54  ;;  %v1051_v63 = vld [vmem:[%s2869_s30 + $0x28] sm:$0xff]  ;;  %p2309_p5 = scmp.ne.s32.totalorder %s2856_s25, 2 }
 0x122   : > { %v2556_v50 = vpack.c.bf16 %v1053_v48, %v1049_v47  ;;  %v1057_v52 = vld [vmem:[%s2869_s30 + $0x58] sm:$0xff]  ;;  %v2558_v55 = vpack.c.bf16 %v1052_v51, %v1048_v49  ;;  %v1056_v57 = vld [vmem:[%s2869_s30 + $0x50] sm:$0xff]  ;;  %v1046_v0 = vld [vmem:[%s2869_s30] sm:$0xff]  ;;  %v2548_v1 = vpack.c.bf16 %v1051_v63, %v1047_v62  ;;  %v1065_v28 = vshrl.u32 %v1064_v27, 7  ;;  %s3314_s24 = sld [smem:[#allocation15_spill]] (!%p2309_p5) }
 0x123   : > { %v1061_v53 = vld [vmem:[%s2869_s30 + $0x78] sm:$0xff]  ;;  %v1060_v58 = vld [vmem:[%s2869_s30 + $0x70] sm:$0xff]  ;;  %v1050_v2 = vld [vmem:[%s2869_s30 + $0x20] sm:$0xff] }
 0x124   : > { %v2560_v56 = vpack.c.bf16 %v1061_v53, %v1057_v52  ;;  %2557 = vmatprep.subr.bf16.mxu1 %v2556_v50  ;;  %v3046_v59 = vld [vmem:[#allocation6] sm:$0xff]  ;;  %v3048_v60 = vld [vmem:[#allocation6 + $0x8] sm:$0xff]  ;;  %v2562_v61 = vpack.c.bf16 %v1060_v58, %v1056_v57  ;;  %v2550_v3 = vpack.c.bf16 %v1050_v2, %v1046_v0  ;;  %2549 = vmatprep.subr.bf16.mxu0 %v2548_v1  ;;  %v3054_v4 = vld [vmem:[#allocation2] sm:$0xff]  ;;  %v1074_v29 = vsub.s32 2, %v1065_v28 }
 0x125   : > { %2559 = vmatpush1.bf16.msra.mxu1 %v2558_v55  ;;  %v3058_v5 = vld [vmem:[#allocation2 + $0x8] sm:$0xff]  ;;  %v1054_v9 = vld [vmem:[%s2869_s30 + $0x40] sm:$0xff]  ;;  %v1028_v12 = vld [vmem:[#allocation4] sm:$0xff]  ;;  %v1078_v31 = vsub.s32 3, %v1065_v28  ;;  %v1070_v62 = vsub.s32 1, %v1065_v28 }
 0x126   : > { %2561 = vmatprep.subr.bf16.mxu1 %v2560_v56  ;;  %2551 = vmatpush1.bf16.msra.mxu0 %v2550_v3  ;;  %v1055_v6 = vld [vmem:[%s2869_s30 + $0x48] sm:$0xff]  ;;  %v1058_v10 = vld [vmem:[%s2869_s30 + $0x60] sm:$0xff]  ;;  %v1247_v16 = vld [vmem:[%s2884_s8 + $0x10] sm:$0xff] }
 0x127   : > { %v1059_v7 = vld [vmem:[%s2869_s30 + $0x68] sm:$0xff]  ;;  %v2554_v11 = vpack.c.bf16 %v1058_v10, %v1054_v9  ;;  %v1245_v13 = vld [vmem:[%s2884_s8] sm:$0xff]  ;;  %v1248_v17 = vld [vmem:[%s2884_s8 + $0x18] sm:$0xff] }
 0x128   : > { %v2552_v8 = vpack.c.bf16 %v1059_v7, %v1055_v6  ;;  %v1246_v14 = vld [vmem:[%s2884_s8 + $0x8] sm:$0xff]  ;;  %v2568_v18 = vpack.c.bf16 %v1248_v17, %v1247_v16  ;;  %v3075_v19 = vld [vmem:[#allocation3] sm:$0xff]  ;;  %v3079_v20 = vld [vmem:[#allocation3 + $0x8] sm:$0xff]  ;;  %s3315_s4 = smov (!%p2309_p5), %s3314_s24 }
 0x129   : > { %2563 = vmatpush1.bf16.msra.mxu1 %v2562_v61  ;;  %v2564_v15 = vpack.c.bf16 %v1246_v14, %v1245_v13  ;;  %v3083_v21 = vld [vmem:[#allocation3 + $0x10] sm:$0xff]  ;;  %v3087_v22 = vld [vmem:[#allocation3 + $0x18] sm:$0xff]  ;;  %v3091_v23 = vld [vmem:[#allocation3 + $0x20] sm:$0xff]  ;;  %v1066_v61 = vsub.s32 0, %v1065_v28 }
 0x12a   : > { %2553 = vmatprep.subr.bf16.mxu0 %v2552_v8  ;;  %v3095_v24 = vld [vmem:[#allocation3 + $0x28] sm:$0xff]  ;;  %v3099_v25 = vld [vmem:[#allocation3 + $0x30] sm:$0xff]  ;;  %v3103_v26 = vld [vmem:[#allocation3 + $0x38] sm:$0xff] }
 0x12b   : > { %2555 = vmatpush1.bf16.msra.mxu0 %v2554_v11  ;;  %2565 = vmatprep.subr.bf16.mxu1 %v2564_v15  ;;  %v1062_v30 = vld [vmem:[%s2874_s1] sm:$0xf]  ;;  %v1029_v44 = vld [vmem:[#allocation4 + $0x8] sm:$0xff]  ;;  %v1031_v46 = vld [vmem:[#allocation4 + $0x18] sm:$0xff] }
 0x12c   : > { %2272 = vmatmul.mubr.msk.f32.vlgmr.msra.gmra.mrb[0].mxu1 %vm1084_vm3, %v3054_v4  ;;  %v1075_v33 = vrot.slane %v1062_v30, %v1074_v29  ;;  %v1079_v35 = vrot.slane %v1062_v30, %v1078_v31  ;;  %v1030_v45 = vld [vmem:[#allocation4 + $0x10] sm:$0xff]  ;;  %v1032_v47 = vld [vmem:[#allocation4 + $0x20] sm:$0xff]  ;;  %v1033_v48 = vld [vmem:[#allocation4 + $0x28] sm:$0xff]  ;;  %v1067_v63 = vrot.slane %v1062_v30, %v1066_v61  ;;  %v1071_v0 = vrot.slane %v1062_v30, %v1070_v62 }
 0x12d   : > { %1238 = vmatprep.mubr.f32.mxu1 %v2759_v54  ;;  %2567 = vmatpush3.bf16.msra.mxu1 %v2564_v15  ;;  %v1034_v49 = vld [vmem:[#allocation4 + $0x30] sm:$0xff]  ;;  %v1035_v50 = vld [vmem:[#allocation4 + $0x38] sm:$0xff]  ;;  %v3114_v51 = vld [vmem:[#allocation5] sm:$0xff] }
 0x12e   : > { %2270 = vmatmul.mubr.msk.f32.vlgmr.msra.gmra.mrb[0].mxu0 %vm1084_vm3, %v3054_v4  ;;  %2569 = vmatprep.subr.bf16.mxu1 %v2568_v18  ;;  %v3119_v52 = vld [vmem:[#allocation5 + $0x8] sm:$0xff]  ;;  %v3121_v53 = vld [vmem:[#allocation5 + $0x10] sm:$0xff]  ;;  %v3129_v55 = vld [vmem:[#allocation5 + $0x20] sm:$0xff] }
 0x12f   : > { %1161 = vmatprep.mubr.f32.mxu0 %v2759_v54  ;;  %v3127_v54 = vld [vmem:[#allocation5 + $0x18] sm:$0xff]  ;;  %v3135_v56 = vld [vmem:[#allocation5 + $0x28] sm:$0xff]  ;;  %v3137_v57 = vld [vmem:[#allocation5 + $0x30] sm:$0xff] }
 0x130   : > { %2273 = vmatmul.mubr.msk.f32.gmra.mrb[2].mxu1 %vm1084_vm3, %v3058_v5  ;;  %v3143_v58 = vld [vmem:[#allocation5 + $0x38] sm:$0xff]  ;;  %v2274_v27 = vld [vmem:[%s628_s23] ss:$0 sm:$0xff] }
 0x131   : > { %2571 = vmatpush3.bf16.msra.mxu1 %v2568_v18  ;;  %2469 = vmatprep.mubr.msk.f32.mxu1 %vm1084_vm3, %v3075_v19 }
 0x132   : > { %2271 = vmatmul.mubr.msk.f32.gmra.mrb[2].mxu0 %vm1084_vm3, %v3058_v5 }
 0x133   : > { %2485 = vmatprep.mubr.msk.f32.mxu0 %vm1385_vm4, %v1028_v12 }
 0x134   : > { %2470 = vmatmul.mubr.msk.f32.vlgmr.msra.gmra.mrb[4].mxu1 %vm1084_vm3, %v3079_v20 }
 0x135   : > { %2472 = vmatprep.mubr.msk.f32.mxu1 %vm1084_vm3, %v3083_v21 }
 0x138   : > { %2473 = vmatmul.mubr.msk.f32.gmra.mrb[6].mxu1 %vm1084_vm3, %v3087_v22 }
 0x139   : > { %2475 = vmatprep.mubr.msk.f32.mxu1 %vm1084_vm3, %v3091_v23 }
 0x13c   : > { %2476 = vmatmul.mubr.msk.f32.gmra.mrb[8].mxu1 %vm1084_vm3, %v3095_v24 }
 0x13d   : > { %2478 = vmatprep.mubr.msk.f32.mxu1 %vm1084_vm3, %v3099_v25 }
 0x140   : > { %2479 = vmatmul.mubr.msk.f32.gmra.mrb[10].mxu1 %vm1084_vm3, %v3103_v26 }
 0x1ff   : > { %v1234_v32 = vpop.f32.mrb[0].mxu1 }
 0x200   : > { %v1236_v34 = vpop.f32.mrb[1].mxu1  ;;  %v1235_v37 = vadd.f32 %v1234_v32, %v1075_v33 }
 0x201   : > { %v1237_v40 = vadd.f32 %v1236_v34, %v1079_v35  ;;  %v1157_v1 = vpop.f32.mrb[0].mxu0 }
 0x202   : > { %v3147_v2 = vadd.f32 %v1157_v1, %v1067_v63  ;;  %v1159_v3 = vpop.f32.mrb[1].mxu0 }
 0x203   : > { %v1240_v36 = vpop.f32.mrb[2].mxu1  ;;  %v3149_v6 = vadd.f32 %v1159_v3, %v1071_v0 }
 0x204   : > { %v1241_v38 = vadd.f32 %v1240_v36, %v1075_v33  ;;  %v1242_v39 = vpop.f32.mrb[3].mxu1 }
 0x205   : > { %v1243_v41 = vadd.f32 %v1242_v39, %v1079_v35  ;;  %v1163_v7 = vpop.f32.mrb[2].mxu0 }
 0x206   : > { %v2572_v42 = vpack.c.bf16 %v1241_v38, %v1235_v37  ;;  %v3151_v8 = vadd.f32 %v1163_v7, %v1067_v63  ;;  %v1165_v9 = vpop.f32.mrb[3].mxu0 }
 0x207   : > { %v2576_v43 = vpack.c.bf16 %v1243_v41, %v1237_v40  ;;  %v3153_v10 = vadd.f32 %v1165_v9, %v1071_v0  ;;  %v2471_v11 = vpop.f32.mrb[4].mxu1 }
 0x208   : > { %2573 = vmatprep.subr.bf16.mxu0 %v2572_v42  ;;  %v1346_v12 = vpop.f32.mrb[5].mxu1  ;;  %v1352_v28 = vadd.f32 %v2471_v11, %v2274_v27 }
 0x209   : > { %2575 = vmatpush3.bf16.msra.mxu0 %v2572_v42  ;;  %v1347_v29 = vadd.f32 %v2274_v27, %v1346_v12 }
 0x20a   : > { %2577 = vmatprep.subr.bf16.mxu0 %v2576_v43 }
 0x20b   : > { %v2474_v13 = vpop.f32.mrb[6].mxu1 }
 0x20c   : > { %2486 = vmatmul.mubr.msk.f32.vlgmr.msra.gmra.mrb[4].mxu0 %vm1385_vm4, %v1029_v44  ;;  %v1356_v14 = vpop.f32.mrb[7].mxu1  ;;  %v1362_v33 = vadd.f32 %v2474_v13, %v2274_v27 }
 0x20d   : > { %2579 = vmatpush3.bf16.msra.mxu0 %v2576_v43  ;;  %2488 = vmatprep.mubr.msk.f32.mxu0 %vm1385_vm4, %v1030_v45  ;;  %v1357_v35 = vadd.f32 %v2274_v27, %v1356_v14 }
 0x20f   : > { %v2477_v15 = vpop.f32.mrb[8].mxu1 }
 0x210   : > { %2489 = vmatmul.mubr.msk.f32.gmra.mrb[6].mxu0 %vm1385_vm4, %v1031_v46  ;;  %v1366_v16 = vpop.f32.mrb[9].mxu1  ;;  %v1372_v42 = vadd.f32 %v2477_v15, %v2274_v27 }
 0x211   : > { %2491 = vmatprep.mubr.msk.f32.mxu0 %vm1385_vm4, %v1032_v47  ;;  %v1367_v45 = vadd.f32 %v2274_v27, %v1366_v16 }
 0x213   : > { %v2480_v17 = vpop.f32.mrb[10].mxu1 }
 0x214   : > { %2492 = vmatmul.mubr.msk.f32.gmra.mrb[8].mxu0 %vm1385_vm4, %v1033_v48  ;;  %v1376_v18 = vpop.f32.mrb[11].mxu1  ;;  %v1382_v61 = vadd.f32 %v2480_v17, %v2274_v27 }
 0x215   : > { %2494 = vmatprep.mubr.msk.f32.mxu0 %vm1385_vm4, %v1034_v49  ;;  %v1377_v62 = vadd.f32 %v2274_v27, %v1376_v18 }
 0x218   : > { %2495 = vmatmul.mubr.msk.f32.gmra.mrb[10].mxu0 %vm1385_vm4, %v1035_v50 }
 0x219   : > { %2501 = vmatprep.mubr.msk.f32.mxu0 %vm1385_vm4, %v3114_v51 }
 0x21c   : > { %2502 = vmatmul.mubr.msk.f32.vlgmr.msra.gmra.mrb[4].mxu0 %vm1385_vm4, %v3119_v52 }
 0x21d   : > { %2504 = vmatprep.mubr.msk.f32.mxu0 %vm1385_vm4, %v3121_v53 }
 0x220   : > { %2505 = vmatmul.mubr.msk.f32.gmra.mrb[6].mxu0 %vm1385_vm4, %v3127_v54 }
 0x221   : > { %2507 = vmatprep.mubr.msk.f32.mxu0 %vm1385_vm4, %v3129_v55 }
 0x224   : > { %2508 = vmatmul.mubr.msk.f32.gmra.mrb[8].mxu0 %vm1385_vm4, %v3135_v56 }
 0x225   : > { %2510 = vmatprep.mubr.msk.f32.mxu0 %vm1385_vm4, %v3137_v57 }
 0x228   : > { %2511 = vmatmul.mubr.msk.f32.gmra.mrb[10].mxu0 %vm1385_vm4, %v3143_v58 }
 0x2ef   : > { %v2503_v30 = vpop.f32.mrb[4].mxu0 }
 0x2f0   : > { %v3160_v31 = vadd.f32 %v2503_v30, %v1352_v28  ;;  %v1605_v32 = vpop.f32.mrb[5].mxu0 }
 0x2f1   : > { %v3162_v34 = vadd.f32 %v1605_v32, %v1347_v29 }
 0x2f2   : > { %v1678_v36 = vmul.f32 %v3160_v31, %v3160_v31 }
 0x2f3   : > { %v1662_v37 = vadd.f32 %v3162_v34, %v3160_v31  ;;  %v1677_v38 = vmul.f32 %v3162_v34, %v3162_v34  ;;  %v2506_v39 = vpop.f32.mrb[6].mxu0 }
 0x2f4   : > { %v3170_v40 = vadd.f32 %v2506_v39, %v1362_v33  ;;  %v1615_v41 = vpop.f32.mrb[7].mxu0 }
 0x2f5   : > { %v1685_v43 = vadd.f32 %v1678_v36, %v1677_v38  ;;  %v2609_v44 = vadd.f32 %v1615_v41, %v1357_v35 }
 0x2f6   : > { %v1680_v63 = vmul.f32 %v3170_v40, %v3170_v40 }
 0x2f7   : > { %v1663_v46 = vadd.f32 %v2609_v44, %v1662_v37  ;;  %v1679_v47 = vmul.f32 %v2609_v44, %v2609_v44  ;;  %v2509_v48 = vpop.f32.mrb[8].mxu0 }
 0x2f8   : > { %v2611_v49 = vadd.f32 %v2509_v48, %v1372_v42  ;;  %v1625_v50 = vpop.f32.mrb[9].mxu0 }
 0x2f9   : > { %v1686_v0 = vadd.f32 %v1685_v43, %v1679_v47  ;;  %v2613_v1 = vadd.f32 %v1625_v50, %v1367_v45  ;;  %v1664_v3 = vadd.f32 %v3170_v40, %v1663_v46 }
 0x2fa   : > { %v1682_v15 = vmul.f32 %v2611_v49, %v2611_v49 }
 0x2fb   : > { %v1665_v7 = vadd.f32 %v2613_v1, %v1664_v3  ;;  %v1681_v9 = vmul.f32 %v2613_v1, %v2613_v1  ;;  %v1687_v11 = vadd.f32 %v1686_v0, %v1680_v63  ;;  %v2512_v12 = vpop.f32.mrb[10].mxu0 }
 0x2fc   : > { %v2615_v13 = vadd.f32 %v2512_v12, %v1382_v61  ;;  %v1635_v14 = vpop.f32.mrb[11].mxu0 }
 0x2fd   : > { %v1688_v16 = vadd.f32 %v1687_v11, %v1681_v9  ;;  %v2617_v28 = vadd.f32 %v1635_v14, %v1377_v62  ;;  %v1666_v29 = vadd.f32 %v2611_v49, %v1665_v7 }
 0x2fe   : > { %v1684_v27 = vmul.f32 %v2615_v13, %v2615_v13 }
 0x2ff   : > { %v1667_v30 = vadd.f32 %v2617_v28, %v1666_v29  ;;  %v1683_v17 = vmul.f32 %v2617_v28, %v2617_v28  ;;  %v1689_v18 = vadd.f32 %v1688_v16, %v1682_v15 }
 0x301   : > { %v1668_v32 = vadd.f32 %v2615_v13, %v1667_v30  ;;  %v1690_v33 = vadd.f32 %v1689_v18, %v1683_v17 }
 0x303   : > { %v1669_v35 = vrot.slane %v1668_v32, 4  ;;  %v1691_v36 = vadd.f32 %v1690_v33, %v1684_v27 }
 0x305   : > { %v1670_v37 = vadd.f32 %v1669_v35, %v1668_v32  ;;  %v1692_v38 = vrot.slane %v1691_v36, 4 }
 0x307   : > { %v1671_v39 = vrot.slane %v1670_v37, 2  ;;  %v1693_v41 = vadd.f32 %v1692_v38, %v1691_v36 }
 0x309   : > { %v1672_v42 = vadd.f32 %v1671_v39, %v1670_v37  ;;  %v1694_v43 = vrot.slane %v1693_v41, 2 }
 0x30b   : > { %v1673_v45 = vrot.slane %v1672_v42, 1  ;;  %v1695_v46 = vadd.f32 %v1694_v43, %v1693_v41 }
 0x30d   : > { %v1674_v47 = vadd.f32 %v1673_v45, %v1672_v42  ;;  %v1696_v48 = vrot.slane %v1695_v46, 1 }
 0x30f   : > { %v1676_v50 = vmul.f32 0.015625, %v1674_v47  ;;  %v1697_v61 = vadd.f32 %v1696_v48, %v1695_v46 }
 0x311   : > { %v1698_v62 = vmul.f32 0.015625, %v1697_v61  ;;  %v1699_v63 = vmul.f32 %v1676_v50, %v1676_v50  ;;  %v1702_v0 = vsub.f32 %v3162_v34, %v1676_v50  ;;  %v1703_v3 = vsub.f32 %v3160_v31, %v1676_v50  ;;  %v2299_v34 = vld [vmem:[%s637_s9] ss:$0 sm:$0xff] }
 0x312   : > { %v1704_v7 = vsub.f32 %v2609_v44, %v1676_v50  ;;  %v1705_v9 = vsub.f32 %v3170_v40, %v1676_v50  ;;  %v1706_v11 = vsub.f32 %v2613_v1, %v1676_v50  ;;  %v1707_v12 = vsub.f32 %v2611_v49, %v1676_v50  ;;  %v2300_v40 = vld [vmem:[%s640_s22] ss:$0 sm:$0xff] }
 0x313   : > { %v1700_v14 = vsub.f32 %v1698_v62, %v1699_v63  ;;  %v1708_v15 = vsub.f32 %v2617_v28, %v1676_v50  ;;  %v1709_v16 = vsub.f32 %v2615_v13, %v1676_v50 }
 0x315   : > { %v1701_v29 = vmax.f32 %v1700_v14, 0.0 }
 0x317   : > { %v1710_v30 = vadd.f32 1e-05, %v1701_v29 }
 0x319   : > { %2675 = vrsqrt.f32 %v1710_v30 }
 0x323   : > { %v2676_v17 = vpop.eup %2675 }
 0x324   : > { %v1712_v18 = vmul.f32 %v2676_v17, %v1702_v0  ;;  %v1713_v31 = vmul.f32 %v2676_v17, %v1703_v3  ;;  %v1714_v44 = vmul.f32 %v2676_v17, %v1704_v7  ;;  %v1715_v27 = vmul.f32 %v2676_v17, %v1705_v9 }
 0x325   : > { %v1716_v49 = vmul.f32 %v2676_v17, %v1706_v11  ;;  %v1717_v1 = vmul.f32 %v2676_v17, %v1707_v12  ;;  %v1718_v13 = vmul.f32 %v2676_v17, %v1708_v15  ;;  %v1719_v28 = vmul.f32 %v2676_v17, %v1709_v16 }
 0x326   : > { %v1726_v32 = vmul.f32 %v2299_v34, %v1712_v18  ;;  %v1727_v33 = vmul.f32 %v2299_v34, %v1713_v31  ;;  %v1728_v35 = vmul.f32 %v2299_v34, %v1714_v44  ;;  %v1729_v36 = vmul.f32 %v2299_v34, %v1715_v27 }
 0x327   : > { %v1730_v37 = vmul.f32 %v2299_v34, %v1716_v49  ;;  %v1731_v38 = vmul.f32 %v2299_v34, %v1717_v1  ;;  %v1732_v39 = vmul.f32 %v2299_v34, %v1718_v13  ;;  %v1733_v41 = vmul.f32 %v2299_v34, %v1719_v28 }
 0x328   : > { %v1740_v42 = vadd.f32 %v2300_v40, %v1726_v32  ;;  %v1741_v43 = vadd.f32 %v2300_v40, %v1727_v33  ;;  %v1742_v45 = vadd.f32 %v2300_v40, %v1728_v35  ;;  %v1743_v46 = vadd.f32 %v2300_v40, %v1729_v36 }
 0x329   : > { %v1744_v47 = vadd.f32 %v2300_v40, %v1730_v37  ;;  %v1745_v48 = vadd.f32 %v2300_v40, %v1731_v38  ;;  %v1746_v50 = vadd.f32 %v2300_v40, %v1732_v39  ;;  %v1747_v0 = vadd.f32 %v2300_v40, %v1733_v41 }
 0x32a   : > { %v2301_v61 = vmul.f32 -1.442695, %v1740_v42  ;;  %v2302_v62 = vmul.f32 -1.442695, %v1741_v43  ;;  %v2303_v63 = vmul.f32 -1.442695, %v1742_v45 }
 0x32b   : > { %v2304_v3 = vmul.f32 -1.442695, %v1743_v46  ;;  %v2305_v7 = vmul.f32 -1.442695, %v1744_v47  ;;  %v2306_v9 = vmul.f32 -1.442695, %v1745_v48 }
 0x32c   : > { %2677 = vpow2.f32 %v2301_v61  ;;  %v2307_v11 = vmul.f32 -1.442695, %v1746_v50  ;;  %v2308_v12 = vmul.f32 -1.442695, %v1747_v0 }
 0x32d   : > { %2679 = vpow2.f32 %v2302_v62 }
 0x32e   : > { %2681 = vpow2.f32 %v2303_v63 }
 0x32f   : > { %2683 = vpow2.f32 %v2304_v3 }
 0x330   : > { %2685 = vpow2.f32 %v2305_v7 }
 0x331   : > { %2687 = vpow2.f32 %v2306_v9 }
 0x332   : > { %2689 = vpow2.f32 %v2307_v11 }
 0x333   : > { %2691 = vpow2.f32 %v2308_v12 }
 0x336   : > { %v2678_v14 = vpop.eup %2677 }
 0x337   : > { %v2680_v15 = vpop.eup %2679  ;;  %v1772_v16 = vadd.f32 1.0, %v2678_v14 }
 0x338   : > { %v2682_v29 = vpop.eup %2681  ;;  %v1773_v30 = vadd.f32 1.0, %v2680_v15 }
 0x339   : > { %v2684_v17 = vpop.eup %2683  ;;  %v1774_v34 = vadd.f32 1.0, %v2682_v29  ;;  %2693 = vrcp.f32 %v1772_v16 }
 0x33a   : > { %v2686_v18 = vpop.eup %2685  ;;  %v1775_v31 = vadd.f32 1.0, %v2684_v17  ;;  %2695 = vrcp.f32 %v1773_v30 }
 0x33b   : > { %v2688_v44 = vpop.eup %2687  ;;  %v1776_v27 = vadd.f32 1.0, %v2686_v18  ;;  %2697 = vrcp.f32 %v1774_v34 }
 0x33c   : > { %v2690_v40 = vpop.eup %2689  ;;  %v1777_v49 = vadd.f32 1.0, %v2688_v44  ;;  %2699 = vrcp.f32 %v1775_v31 }
 0x33d   : > { %v2692_v1 = vpop.eup %2691  ;;  %v1778_v13 = vadd.f32 1.0, %v2690_v40  ;;  %2701 = vrcp.f32 %v1776_v27 }
 0x33e   : > { %v1779_v28 = vadd.f32 1.0, %v2692_v1  ;;  %2703 = vrcp.f32 %v1777_v49 }
 0x33f   : > { %2705 = vrcp.f32 %v1778_v13 }
 0x340   : > { %2707 = vrcp.f32 %v1779_v28 }
 0x343   : > { %v2694_v32 = vpop.eup %2693 }
 0x344   : > { %v2696_v33 = vpop.eup %2695  ;;  %v1796_v35 = vmul.f32 %v2694_v32, %v1740_v42 }
 0x345   : > { %v2698_v36 = vpop.eup %2697  ;;  %v1797_v37 = vmul.f32 %v2696_v33, %v1741_v43 }
 0x346   : > { %v2700_v38 = vpop.eup %2699  ;;  %v1798_v39 = vmul.f32 %v2698_v36, %v1742_v45  ;;  %v1804_v41 = vadd.f32 %v1796_v35, %v3075_v19 }
 0x347   : > { %v2702_v61 = vpop.eup %2701  ;;  %v1799_v62 = vmul.f32 %v2700_v38, %v1743_v46  ;;  %v1805_v63 = vadd.f32 %v1797_v37, %v3079_v20 }
 0x348   : > { %v2704_v3 = vpop.eup %2703  ;;  %v1800_v7 = vmul.f32 %v2702_v61, %v1744_v47  ;;  %v1806_v9 = vadd.f32 %v1798_v39, %v3083_v21  ;;  %1812 = vst [vmem:[#allocation3] sm:$0xff] %v1804_v41  ;;  %1824 = vst.msk [vmem:[%s3314_s24] sm:$0xff] (!%p2309_p5), %vm1084_vm3, %v1804_v41 }
 0x349   : > { %v2706_v11 = vpop.eup %2705  ;;  %v1801_v12 = vmul.f32 %v2704_v3, %v1745_v48  ;;  %v1807_v14 = vadd.f32 %v1799_v62, %v3087_v22  ;;  %1813 = vst [vmem:[#allocation3 + $0x8] sm:$0xff] %v1805_v63  ;;  %1823 = sbr.rel (%p2309_p5) target bundleno = 848 (0x350), region = 96  ;;  %1825 = vst.msk [vmem:[%s3315_s4 + $0x8] sm:$0xff] (!%p2309_p5), %vm1084_vm3, %v1805_v63 }
 0x34a   : > { %v2708_v42 = vpop.eup %2707  ;;  %v1802_v43 = vmul.f32 %v2706_v11, %v1746_v50  ;;  %v1808_v45 = vadd.f32 %v1800_v7, %v3091_v23  ;;  %1814 = vst [vmem:[#allocation3 + $0x10] sm:$0xff] %v1806_v9  ;;  %1826 = vst.msk [vmem:[%s3315_s4 + $0x10] sm:$0xff] (!%p2309_p5), %vm1084_vm3, %v1806_v9 }
 0x34b   : > { %v1803_v15 = vmul.f32 %v2708_v42, %v1747_v0  ;;  %v1809_v46 = vadd.f32 %v1801_v12, %v3095_v24  ;;  %1815 = vst [vmem:[#allocation3 + $0x18] sm:$0xff] %v1807_v14  ;;  %1827 = vst.msk [vmem:[%s3315_s4 + $0x18] sm:$0xff] (!%p2309_p5), %vm1084_vm3, %v1807_v14 }
 0x34c   : > { %v1810_v16 = vadd.f32 %v1802_v43, %v3099_v25  ;;  %1816 = vst [vmem:[#allocation3 + $0x20] sm:$0xff] %v1808_v45  ;;  %1828 = vst.msk [vmem:[%s3315_s4 + $0x20] sm:$0xff] (!%p2309_p5), %vm1084_vm3, %v1808_v45 }
 0x34d   : > { %v1811_v47 = vadd.f32 %v1803_v15, %v3103_v26  ;;  %1817 = vst [vmem:[#allocation3 + $0x28] sm:$0xff] %v1809_v46  ;;  %1829 = vst.msk [vmem:[%s3315_s4 + $0x28] sm:$0xff] (!%p2309_p5), %vm1084_vm3, %v1809_v46 }
 0x34e   : > { %1818 = vst [vmem:[#allocation3 + $0x30] sm:$0xff] %v1810_v16  ;;  %1830 = vst.msk [vmem:[%s3315_s4 + $0x30] sm:$0xff] (!%p2309_p5), %vm1084_vm3, %v1810_v16 }
 0x34f   : > { %1819 = vst [vmem:[#allocation3 + $0x38] sm:$0xff] %v1811_v47  ;;  %1831 = vst.msk [vmem:[%s3315_s4 + $0x38] sm:$0xff] (!%p2309_p5), %vm1084_vm3, %v1811_v47 }
 0x350 PF: > { %v2580_v48 = vpack.c.bf16 %v3153_v10, %v3149_v6  ;;  %2517 = vmatprep.mubr.msk.f32.mxu1 %vm1385_vm4, %v3114_v51  ;;  %vm1993_vm5 = vcmask 523264   ;;  %v2319_v51 = vmul.f32 -1.442695, %v3079_v20  ;;  %s3316_s29 = scalar_lea.vmem %s3290_s14, %s2862_s26 }
 0x352   : > { %2581 = vmatprep.subr.bf16.mxu1 %v2580_v48  ;;  %2709 = vpow2.f32 %v2319_v51 }
 0x353   : > { %2583 = vmatpush3.bf16.msra.mxu1 %v2580_v48 }
 0x356   : > { %2518 = vmatmul.mubr.msk.f32.vlgmr.msra.gmra.mrb[12].mxu1 %vm1385_vm4, %v3119_v52  ;;  %v2318_v52 = vmul.f32 -1.442695, %v3075_v19 }
 0x357   : > { %2520 = vmatprep.mubr.msk.f32.mxu1 %vm1385_vm4, %v3121_v53  ;;  %v2321_v53 = vmul.f32 -1.442695, %v3087_v22 }
 0x358   : > { %2711 = vpow2.f32 %v2318_v52 }
 0x359   : > { %2713 = vpow2.f32 %v2321_v53 }
 0x35a   : > { %2521 = vmatmul.mubr.msk.f32.gmra.mrb[14].mxu1 %vm1385_vm4, %v3127_v54  ;;  %v2320_v54 = vmul.f32 -1.442695, %v3083_v21 }
 0x35b   : > { %2523 = vmatprep.mubr.msk.f32.mxu1 %vm1385_vm4, %v3129_v55  ;;  %v2323_v55 = vmul.f32 -1.442695, %v3095_v24 }
 0x35c   : > { %2715 = vpow2.f32 %v2320_v54  ;;  %v2710_v20 = vpop.eup %2709 }
 0x35d   : > { %2717 = vpow2.f32 %v2323_v55 }
 0x35e   : > { %2524 = vmatmul.mubr.msk.f32.gmra.mrb[16].mxu1 %vm1385_vm4, %v3135_v56  ;;  %v2322_v56 = vmul.f32 -1.442695, %v3091_v23 }
 0x35f   : > { %2526 = vmatprep.mubr.msk.f32.mxu1 %vm1385_vm4, %v3137_v57  ;;  %v2325_v57 = vmul.f32 -1.442695, %v3103_v26 }
 0x360   : > { %2719 = vpow2.f32 %v2322_v56 }
 0x361   : > { %2721 = vpow2.f32 %v2325_v57 }
 0x362   : > { %2527 = vmatmul.mubr.msk.f32.gmra.mrb[18].mxu1 %vm1385_vm4, %v3143_v58  ;;  %v2712_v19 = vpop.eup %2711  ;;  %v1962_v58 = vadd.f32 1.0, %v2710_v20 }
 0x363   : > { %2545 = vmatprep.mubr.msk.f32.mxu1 %vm1993_vm5, %v3046_v59  ;;  %v2324_v59 = vmul.f32 -1.442695, %v3099_v25  ;;  %v2714_v22 = vpop.eup %2713  ;;  %v1961_v6 = vadd.f32 1.0, %v2712_v19 }
 0x364   : > { %v1964_v10 = vadd.f32 1.0, %v2714_v22 }
 0x365   : > { %2723 = vpow2.f32 %v2324_v59 }
 0x366   : > { %v2716_v21 = vpop.eup %2715  ;;  %2725 = vrcp.f32 %v1962_v58 }
 0x367   : > { %v2718_v24 = vpop.eup %2717  ;;  %2727 = vrcp.f32 %v1961_v6  ;;  %v1963_v50 = vadd.f32 1.0, %v2716_v21 }
 0x368   : > { %2729 = vrcp.f32 %v1964_v10  ;;  %v1966_v0 = vadd.f32 1.0, %v2718_v24 }
 0x369   : > { %2731 = vrcp.f32 %v1963_v50 }
 0x36a   : > { %v2720_v23 = vpop.eup %2719  ;;  %2733 = vrcp.f32 %v1966_v0 }
 0x36b   : > { %v2722_v26 = vpop.eup %2721  ;;  %v1965_v29 = vadd.f32 1.0, %v2720_v23 }
 0x36c   : > { %v1968_v30 = vadd.f32 1.0, %v2722_v26  ;;  %v2328_v26 = vld [vmem:[%s631_s27] ss:$0 sm:$0xff] }
 0x36d   : > { %2735 = vrcp.f32 %v1965_v29 }
 0x36e   : > { %2737 = vrcp.f32 %v1968_v30  ;;  %v2329_v30 = vld [vmem:[%s3316_s29] ss:$0 sm:$0xff] }
 0x36f   : > { %v2724_v25 = vpop.eup %2723 }
 0x370   : > { %v1967_v17 = vadd.f32 1.0, %v2724_v25  ;;  %v2726_v34 = vpop.eup %2725 }
 0x371   : > { %v2728_v18 = vpop.eup %2727 }
 0x372   : > { %2739 = vrcp.f32 %v1967_v17  ;;  %v2730_v40 = vpop.eup %2729 }
 0x373   : > { %v2732_v1 = vpop.eup %2731 }
 0x374   : > { %v2734_v35 = vpop.eup %2733 }
 0x377   : > { %v2736_v37 = vpop.eup %2735 }
 0x378   : > { %v2738_v62 = vpop.eup %2737 }
 0x37c   : > { %v2740_v3 = vpop.eup %2739 }
 0x429   : > { %v2519_v31 = vpop.f32.mrb[12].mxu1 }
 0x42a   : > { %v1986_v44 = vmul.f32 %v2726_v34, %v2519_v31  ;;  %v1898_v27 = vpop.f32.mrb[13].mxu1 }
 0x42b   : > { %v1985_v49 = vmul.f32 %v2728_v18, %v1898_v27 }
 0x42d   : > { %v2584_v13 = vpack.c.bf16 %v1986_v44, %v1985_v49  ;;  %v2522_v28 = vpop.f32.mrb[14].mxu1 }
 0x42e   : > { %v1988_v32 = vmul.f32 %v2730_v40, %v2522_v28  ;;  %v1908_v33 = vpop.f32.mrb[15].mxu1 }
 0x42f   : > { %v1987_v36 = vmul.f32 %v2732_v1, %v1908_v33  ;;  %2585 = vmatprep.subr.bf16.mxu1 %v2584_v13 }
 0x430   : > { %2587 = vmatpush3.bf16.msra.mxu1 %v2584_v13 }
 0x431   : > { %v2588_v38 = vpack.c.bf16 %v1988_v32, %v1987_v36  ;;  %v2525_v39 = vpop.f32.mrb[16].mxu1 }
 0x432   : > { %v1990_v41 = vmul.f32 %v2734_v35, %v2525_v39  ;;  %v1918_v61 = vpop.f32.mrb[17].mxu1 }
 0x433   : > { %v1989_v63 = vmul.f32 %v2736_v37, %v1918_v61  ;;  %2589 = vmatprep.subr.bf16.mxu1 %v2588_v38 }
 0x434   : > { %2591 = vmatpush3.bf16.msra.mxu1 %v2588_v38 }
 0x435   : > { %v2592_v7 = vpack.c.bf16 %v1990_v41, %v1989_v63  ;;  %v2528_v9 = vpop.f32.mrb[18].mxu1 }
 0x436   : > { %v1992_v11 = vmul.f32 %v2738_v62, %v2528_v9  ;;  %v1928_v12 = vpop.f32.mrb[19].mxu1 }
 0x437   : > { %v1991_v14 = vmul.f32 %v2740_v3, %v1928_v12  ;;  %2593 = vmatprep.subr.bf16.mxu1 %v2592_v7 }
 0x438   : > { %2595 = vmatpush3.bf16.msra.mxu1 %v2592_v7 }
 0x439   : > { %v2596_v42 = vpack.c.bf16 %v1992_v11, %v1991_v14 }
 0x43b   : > { %2597 = vmatprep.subr.bf16.mxu1 %v2596_v42 }
 0x43c   : > { %2599 = vmatpush3.bf16.msra.mxu1 %v2596_v42 }
 0x43f   : > { %2546 = vmatmul.mubr.msk.f32.vlgmr.msra.gmra.mrb[20].mxu1 %vm1993_vm5, %v3048_v60 }
 0x512   : > { %v2547_v43 = vpop.f32.mrb[20].mxu1 }
 0x513   : > { %v2076_v45 = vadd.f32 %v2547_v43, %v3151_v8  ;;  %v2066_v15 = vpop.f32.mrb[21].mxu1 }
 0x514   : > { %v2075_v46 = vadd.f32 %v2066_v15, %v3147_v2 }
 0x515   : > { %v2089_v16 = vmul.f32 %v2076_v45, %v2076_v45 }
 0x516   : > { %v2079_v47 = vadd.f32 %v2076_v45, %v2075_v46  ;;  %v2088_v48 = vmul.f32 %v2075_v46, %v2075_v46 }
 0x518   : > { %v2080_v51 = vrot.slane %v2079_v47, 4  ;;  %v2090_v52 = vadd.f32 %v2089_v16, %v2088_v48 }
 0x51a   : > { %v2081_v53 = vadd.f32 %v2080_v51, %v2079_v47  ;;  %v2091_v54 = vrot.slane %v2090_v52, 4 }
 0x51c   : > { %v2082_v55 = vrot.slane %v2081_v53, 2  ;;  %v2092_v56 = vadd.f32 %v2091_v54, %v2090_v52 }
 0x51e   : > { %v2083_v57 = vadd.f32 %v2082_v55, %v2081_v53  ;;  %v2093_v59 = vrot.slane %v2092_v56, 2 }
 0x520   : > { %v2084_v20 = vrot.slane %v2083_v57, 1  ;;  %v2094_v60 = vadd.f32 %v2093_v59, %v2092_v56 }
 0x522   : > { %v2085_v19 = vadd.f32 %v2084_v20, %v2083_v57  ;;  %v2095_v8 = vrot.slane %v2094_v60, 1 }
 0x524   : > { %v2087_v58 = vmul.f32 0.0625, %v2085_v19  ;;  %v2096_v22 = vadd.f32 %v2095_v8, %v2094_v60 }
 0x526   : > { %v2097_v2 = vmul.f32 0.0625, %v2096_v22  ;;  %v2098_v6 = vmul.f32 %v2087_v58, %v2087_v58  ;;  %v2101_v21 = vsub.f32 %v2075_v46, %v2087_v58  ;;  %v2102_v10 = vsub.f32 %v2076_v45, %v2087_v58 }
 0x528   : > { %v2099_v24 = vsub.f32 %v2097_v2, %v2098_v6 }
 0x52a   : > { %v2100_v50 = vmax.f32 %v2099_v24, 0.0 }
 0x52c   : > { %v2103_v23 = vadd.f32 1e-05, %v2100_v50 }
 0x52e   : > { %2741 = vrsqrt.f32 %v2103_v23 }
 0x538   : > { %v2742_v0 = vpop.eup %2741 }
 0x539   : > { %v2105_v29 = vmul.f32 %v2742_v0, %v2101_v21  ;;  %v2106_v25 = vmul.f32 %v2742_v0, %v2102_v10 }
 0x53b   : > { %v2113_v17 = vmul.f32 %v2328_v26, %v2105_v29  ;;  %v2114_v34 = vmul.f32 %v2328_v26, %v2106_v25 }
 0x53d   : > { %v2121_v18 = vadd.f32 %v2329_v30, %v2113_v17  ;;  %v2122_v31 = vadd.f32 %v2329_v30, %v2114_v34 }
 0x53f   : > { %v2330_v44 = vmul.f32 -1.442695, %v2121_v18  ;;  %v2331_v27 = vmul.f32 -1.442695, %v2122_v31 }
 0x541   : > { %2743 = vpow2.f32 %v2330_v44 }
 0x542   : > { %2745 = vpow2.f32 %v2331_v27 }
 0x54b   : > { %v2744_v40 = vpop.eup %2743 }
 0x54c   : > { %v2746_v49 = vpop.eup %2745  ;;  %v2129_v1 = vadd.f32 1.0, %v2744_v40 }
 0x54d   : > { %v2130_v13 = vadd.f32 1.0, %v2746_v49 }
 0x54e   : > { %2747 = vrcp.f32 %v2129_v1 }
 0x54f   : > { %2749 = vrcp.f32 %v2130_v13 }
 0x558   : > { %v2748_v28 = vpop.eup %2747 }
 0x559   : > { %v2750_v32 = vpop.eup %2749  ;;  %v2135_v33 = vmul.f32 %v2748_v28, %v2121_v18 }
 0x55a   : > { %v2136_v35 = vmul.f32 %v2750_v32, %v2122_v31 }
 0x55b   : > { %v2137_v36 = vadd.f32 %v2135_v33, %v3054_v4 }
 0x55c   : > { %v2138_v37 = vadd.f32 %v2136_v35, %v3058_v5 }
 0x55d   : > { %2139 = vst [vmem:[#allocation2] sm:$0xff] %v2137_v36 }
 0x55e   : > { %2140 = vst [vmem:[#allocation2 + $0x8] sm:$0xff] %v2138_v37 }
 0x55f PF: > { %s3317_s26 = sld [smem:[#allocation7_spill]] }
 0x565   : > { %s27_s24 = sadd.s32 1, %s3317_s26  }
 0x566   : > { %p24_p6 = scmp.ge.s32.totalorder %s27_s24, 5  }
 0x568   :  { %26 = sbr.rel (!%p24_p6) target bundleno = 9 (0x9), region = 143 }

</bundles_post_ra>
